<compile_context>
chip_gen: v5e
topology: v5e:2x2
jax: 0.10.0
libtpu: 0.0.40
codegen_flags: <defaults>
</compile_context>

<pallas_src>
import functools

import jax
import jax.numpy as jnp
import numpy as np
from jax.experimental import pallas as pl
from jax.experimental.pallas import tpu as pltpu

BN_EPS = 1e-5
_LANE = 128      # lane width: pad K / Cout / E to multiples of this
_SUBLANE = 16    # sublane multiple (covers bf16 packed (16,128) tiling too)


def _round_up(x, m):
    return (x + m - 1) // m * m


def _pad2d(a, rows, cols):
    r, c = a.shape
    if r == rows and c == cols:
        return a
    return jnp.pad(a, ((0, rows - r), (0, cols - c)))


# ----------------------------------------------------------------------------
# Pallas kernels
# ----------------------------------------------------------------------------
def _accumulate_stats(y, m_idx, sum_ref, ssq_ref):
    @pl.when(m_idx == 0)
    def _init():
        sum_ref[...] = jnp.zeros_like(sum_ref)
        ssq_ref[...] = jnp.zeros_like(ssq_ref)

    sum_ref[...] += jnp.sum(y, axis=0, keepdims=True)
    ssq_ref[...] += jnp.sum(y * y, axis=0, keepdims=True)


def _finalize_scale_shift(sum_ref, ssq_ref, g_ref, bt_ref, inv_m):
    """Turn accumulated sum / sum-sq into BN scale / shift, stored IN PLACE
    over the same scratch (sum_ref <- scale, ssq_ref <- shift)."""
    mean = sum_ref[...] * inv_m
    var = jnp.maximum(ssq_ref[...] * inv_m - mean * mean, 0.0)
    scale = g_ref[...] * jax.lax.rsqrt(var + BN_EPS)
    shift = bt_ref[...] - mean * scale
    sum_ref[...] = scale
    ssq_ref[...] = shift


def _conv_bn_relu_kernel(p_ref, w_ref, g_ref, bt_ref, o_ref, sum_ref, ssq_ref,
                         *, true_m):
    """Fused im2col-GEMM + BatchNorm(training) + ReLU, two-sweep over M tiles.

    grid = (phase, m_tile);  phase 0: accumulate per-channel sum / sum-sq,
                             phase 1: recompute GEMM tile, normalize, ReLU.
    p_ref : [tile_m, K_pad]   im2col patches (zero rows for M padding)
    w_ref : [K_pad, C_pad]    conv weights (HWIO flattened, zero padded)
    g_ref, bt_ref : [1, C_pad]  BN gamma / beta (f32)
    o_ref : [tile_m, C_pad]
    sum_ref, ssq_ref : [1, C_pad] f32 VMEM scratch; after the first phase-1
                       step they hold the BN scale / shift instead.
    """
    phase = pl.program_id(0)
    m_idx = pl.program_id(1)

    y = jnp.dot(p_ref[...], w_ref[...], preferred_element_type=jnp.float32)

    @pl.when(phase == 0)
    def _stats():
        _accumulate_stats(y, m_idx, sum_ref, ssq_ref)

    @pl.when(jnp.logical_and(phase == 1, m_idx == 0))
    def _finalize():
        _finalize_scale_shift(sum_ref, ssq_ref, g_ref, bt_ref,
                              jnp.float32(1.0 / true_m))

    @pl.when(phase == 1)
    def _normalize():
        o_ref[...] = jnp.maximum(y * sum_ref[...] + ssq_ref[...],
                                 0.0).astype(o_ref.dtype)


def _conv_bn_relu_proj_kernel(p_ref, w_ref, g_ref, bt_ref, wp_ref, bp_ref,
                              o_ref, sum_ref, ssq_ref, *, true_m, cdt):
    """Same as above, plus the final 1x1 projection conv fused into phase 1."""
    phase = pl.program_id(0)
    m_idx = pl.program_id(1)

    y = jnp.dot(p_ref[...], w_ref[...], preferred_element_type=jnp.float32)

    @pl.when(phase == 0)
    def _stats():
        _accumulate_stats(y, m_idx, sum_ref, ssq_ref)

    @pl.when(jnp.logical_and(phase == 1, m_idx == 0))
    def _finalize():
        _finalize_scale_shift(sum_ref, ssq_ref, g_ref, bt_ref,
                              jnp.float32(1.0 / true_m))

    @pl.when(phase == 1)
    def _normalize_project():
        z = jnp.maximum(y * sum_ref[...] + ssq_ref[...], 0.0)
        proj = jnp.dot(z.astype(cdt), wp_ref[...],
                       preferred_element_type=jnp.float32)
        o_ref[...] = (proj + bp_ref[...]).astype(o_ref.dtype)


# ----------------------------------------------------------------------------
# Glue: im2col + pallas_call wrappers
# ----------------------------------------------------------------------------
def _im2col(x_nhwc, ksize, stride, pad):
    """Extract conv patches. K-axis ordering is (kh, kw, cin)."""
    n, h, w, c = x_nhwc.shape
    hout = (h + 2 * pad - ksize) // stride + 1
    wout = (w + 2 * pad - ksize) // stride + 1
    xp = jnp.pad(x_nhwc, ((0, 0), (pad, pad), (pad, pad), (0, 0)))
    cols = []
    for kh in range(ksize):
        for kw in range(ksize):
            cols.append(
                xp[:, kh:kh + stride * hout:stride, kw:kw + stride * wout:stride, :]
            )
    patches = jnp.concatenate(cols, axis=-1)  # [N, Hout, Wout, kh*kw*Cin]
    return patches.reshape(n * hout * wout, ksize * ksize * c), (n, hout, wout)


def conv_bn_relu_layer(x_nhwc, w_hwio, gamma, beta, stride, *,
                       compute_dtype=jnp.float32, proj=None, tile_m_cap=256):
    """One Conv(k=4, pad=1) + BN(train) + ReLU layer; optionally fuses the
    final 1x1 projection conv (proj = (w_hwio_1x1, bias)) into its epilogue."""
    ksize, _, cin, cout = w_hwio.shape
    patches, (n, hout, wout) = _im2col(x_nhwc, ksize, stride, pad=1)
    m, kdim = patches.shape

    tile_m = min(tile_m_cap, _round_up(m, _SUBLANE))
    m_pad = _round_up(m, tile_m)
    k_pad = _round_up(kdim, _LANE)
    c_pad = _round_up(cout, _LANE)     # lane-dense output / MXU N dimension

    # Zero padding: padded M rows contribute exactly 0 to sum / sum-sq (no
    # conv bias is added), so dividing by the true M keeps BN stats exact.
    patches_p = _pad2d(patches.astype(compute_dtype), m_pad, k_pad)
    w2d = _pad2d(w_hwio.reshape(kdim, cout).astype(compute_dtype), k_pad, c_pad)
    g2d = _pad2d(gamma.reshape(1, cout).astype(jnp.float32), 1, c_pad)
    bt2d = _pad2d(beta.reshape(1, cout).astype(jnp.float32), 1, c_pad)

    n_m = m_pad // tile_m
    grid = (2, n_m)   # (phase, m_tile); phase 0 = stats sweep, 1 = write sweep

    in_specs = [
        pl.BlockSpec((tile_m, k_pad), lambda p, mi: (mi, 0)),
        pl.BlockSpec((k_pad, c_pad), lambda p, mi: (0, 0)),
        pl.BlockSpec((1, c_pad), lambda p, mi: (0, 0)),
        pl.BlockSpec((1, c_pad), lambda p, mi: (0, 0)),
    ]
    # Phase-0 steps never write the output; collapsing their block index onto
    # block 0 means no block change (hence no writeback DMA) until phase 1
    # actually produces data -> each output block hits HBM exactly once.
    out_index_map = lambda p, mi: (mi * p, 0)
    scratch = [pltpu.VMEM((1, c_pad), jnp.float32),
               pltpu.VMEM((1, c_pad), jnp.float32)]
    compiler_params = pltpu.CompilerParams(
        # Both axes "arbitrary": the BN sum/sum-sq scratch is accumulated
        # across M tiles, so the M axis must not be sharded across cores.
        dimension_semantics=("arbitrary", "arbitrary"),
        vmem_limit_bytes=32 * 1024 * 1024,   # safe on v5e/v6e (128 MiB) & v7x (64 MiB)
    )

    if proj is None:
        out = pl.pallas_call(
            functools.partial(_conv_bn_relu_kernel, true_m=m),
            out_shape=jax.ShapeDtypeStruct((m_pad, c_pad), compute_dtype),
            grid_spec=pltpu.PrefetchScalarGridSpec(
                num_scalar_prefetch=0, grid=grid,
                in_specs=in_specs,
                out_specs=pl.BlockSpec((tile_m, c_pad), out_index_map),
                scratch_shapes=scratch),
            compiler_params=compiler_params,
        )(patches_p, w2d, g2d, bt2d)
        return out[:m, :cout].reshape(n, hout, wout, cout)

    wp_hwio, bp = proj
    e = wp_hwio.shape[-1]
    e_pad = _round_up(e, _LANE)
    wp2d = _pad2d(wp_hwio.reshape(cout, e).astype(compute_dtype), c_pad, e_pad)
    bp2d = _pad2d(bp.reshape(1, e).astype(jnp.float32), 1, e_pad)

    out = pl.pallas_call(
        functools.partial(_conv_bn_relu_proj_kernel, true_m=m, cdt=compute_dtype),
        out_shape=jax.ShapeDtypeStruct((m_pad, e_pad), jnp.float32),
        grid_spec=pltpu.PrefetchScalarGridSpec(
            num_scalar_prefetch=0, grid=grid,
            in_specs=in_specs + [
                pl.BlockSpec((c_pad, e_pad), lambda p, mi: (0, 0)),
                pl.BlockSpec((1, e_pad), lambda p, mi: (0, 0)),
            ],
            out_specs=pl.BlockSpec((tile_m, e_pad), out_index_map),
            scratch_shapes=scratch),
        compiler_params=compiler_params,
    )(patches_p, w2d, g2d, bt2d, wp2d, bp2d)
    return out[:m, :e].reshape(n, hout, wout, e)


# ----------------------------------------------------------------------------
# Encoder: parameter init + forward
# ----------------------------------------------------------------------------
def init_encoder_params(key, in_channels, hidden_dims, embedding_dim):
    """Deterministic synthetic init (PyTorch-like uniform fan-in bounds)."""
    params = []
    prev = in_channels
    for h in hidden_dims:
        key, k1, k2 = jax.random.split(key, 3)
        bound = 1.0 / np.sqrt(prev * 4 * 4)
        w = jax.random.uniform(k1, (4, 4, prev, h), jnp.float32, -bound, bound)
        b = jax.random.uniform(k2, (h,), jnp.float32, -bound, bound)
        gamma = jnp.ones((h,), jnp.float32)   # BatchNorm2d weight init
        beta = jnp.zeros((h,), jnp.float32)   # BatchNorm2d bias init
        params.append((w, b, gamma, beta))
        prev = h
    key, k1, k2 = jax.random.split(key, 3)
    bound = 1.0 / np.sqrt(prev)
    w = jax.random.uniform(k1, (1, 1, prev, embedding_dim), jnp.float32, -bound, bound)
    b = jax.random.uniform(k2, (embedding_dim,), jnp.float32, -bound, bound)
    params.append((w, b))
    return params


def encoder_forward(params, x_nchw, *, compute_dtype=jnp.float32):
    """NCHW in (PyTorch convention) -> NHWC internally -> NCHW out."""
    n_hidden = len(params) - 1
    assert n_hidden >= 1
    x = jnp.transpose(x_nchw, (0, 2, 3, 1)).astype(compute_dtype)
    wp, bp = params[-1]
    for i in range(n_hidden):
        # Conv bias `b` is intentionally unused: BatchNorm's mean subtraction
        # cancels a per-channel bias exactly.
        w, b, g, bt = params[i]
        stride = 2 if i < n_hidden - 1 else 1
        proj = (wp, bp) if i == n_hidden - 1 else None
        x = conv_bn_relu_layer(x, w, g, bt, stride,
                               compute_dtype=compute_dtype, proj=proj)
    return jnp.transpose(x, (0, 3, 1, 2))


# ----------------------------------------------------------------------------
# Pure-JAX reference (full PyTorch semantics, f32, incl. conv bias)
# ----------------------------------------------------------------------------
def encoder_reference(params, x_nchw):
    x = jnp.transpose(x_nchw, (0, 2, 3, 1)).astype(jnp.float32)
    n_hidden = len(params) - 1
    dn = ("NHWC", "HWIO", "NHWC")
    for i in range(n_hidden):
        w, b, g, bt = params[i]
        stride = 2 if i < n_hidden - 1 else 1
        y = jax.lax.conv_general_dilated(
            x, w, (stride, stride), [(1, 1), (1, 1)], dimension_numbers=dn
        ) + b
        mean = jnp.mean(y, axis=(0, 1, 2), keepdims=True)
        var = jnp.mean((y - mean) ** 2, axis=(0, 1, 2), keepdims=True)
        x = jnp.maximum((y - mean) * jax.lax.rsqrt(var + BN_EPS) * g + bt, 0.0)
    w, b = params[-1]
    y = jax.lax.conv_general_dilated(
        x, w, (1, 1), [(0, 0), (0, 0)], dimension_numbers=dn
    ) + b
    return jnp.transpose(y, (0, 3, 1, 2))


# ----------------------------------------------------------------------------
if __name__ == "__main__":
    in_channels = 4
    hidden_dims = [16, 32]
    embedding_dim = 8

    key = jax.random.PRNGKey(0)
    key, kx = jax.random.split(key)
    x = jax.random.normal(kx, (2, in_channels, 16, 16), dtype=jnp.float32)

    params = init_encoder_params(key, in_channels, hidden_dims, embedding_dim)

    # f32 MXU path (exact module semantics).
    fwd_f32 = jax.jit(functools.partial(encoder_forward, compute_dtype=jnp.float32))
    out = jax.block_until_ready(fwd_f32(params, x))

    # expected shapes: 16 -(k4,s2,p1)-> 8 -(k4,s1,p1)-> 7 -(k1)-> 7
    assert out.shape == (2, embedding_dim, 7, 7), out.shape

    ref = jax.block_until_ready(encoder_reference(params, x))
    np.testing.assert_allclose(np.asarray(out), np.asarray(ref), rtol=1e-4, atol=1e-4)

    # bf16 MXU-input path (v6e/v7x optimization; f32 accumulation + f32 BN math).
    fwd_bf16 = jax.jit(functools.partial(encoder_forward, compute_dtype=jnp.bfloat16))
    out_bf16 = jax.block_until_ready(fwd_bf16(params, x))
    np.testing.assert_allclose(np.asarray(out_bf16), np.asarray(ref),
                               rtol=5e-2, atol=5e-2)

    print("KERNEL_OK")
</pallas_src>

<mosaic_0001>
module attributes {stable_mosaic.version = 11 : i64} {
  func.func @_conv_bn_relu_kernel(%arg0: i32, %arg1: i32, %arg2: memref<128x128xf32, #tpu.memory_space<vmem>>, %arg3: memref<128x128xf32, #tpu.memory_space<vmem>>, %arg4: memref<1x128xf32, #tpu.memory_space<vmem>>, %arg5: memref<1x128xf32, #tpu.memory_space<vmem>>, %arg6: memref<128x128xf32, #tpu.memory_space<vmem>>, %arg7: memref<1x128xf32, #tpu.memory_space<vmem>>, %arg8: memref<1x128xf32, #tpu.memory_space<vmem>>) attributes {dimension_semantics = [#tpu.dimension_semantics<arbitrary>, #tpu.dimension_semantics<arbitrary>], iteration_bounds = array<i64: 2, 1>, scalar_prefetch = 0 : i64, scratch_operands = 2 : i64, tpu.core_type = #tpu.core_type<tc>, window_params = [{transform_indices = @transform_0, window_bounds = array<i64: 128, 128>}, {pipeline_mode = #tpu.pipeline_mode<synchronous>, transform_indices = @transform_1, window_bounds = array<i64: 128, 128>}, {pipeline_mode = #tpu.pipeline_mode<synchronous>, transform_indices = @transform_2, window_bounds = array<i64: 1, 128>}, {pipeline_mode = #tpu.pipeline_mode<synchronous>, transform_indices = @transform_3, window_bounds = array<i64: 1, 128>}, {transform_indices = @transform_4, window_bounds = array<i64: 128, 128>}]} {
    %c0 = arith.constant 0 : index
    %c0_0 = arith.constant 0 : index
    %0 = vector.load %arg2[%c0, %c0_0] : memref<128x128xf32, #tpu.memory_space<vmem>>, vector<128x128xf32>
    %c0_1 = arith.constant 0 : index
    %c0_2 = arith.constant 0 : index
    %1 = vector.load %arg3[%c0_1, %c0_2] : memref<128x128xf32, #tpu.memory_space<vmem>>, vector<128x128xf32>
    %cst = arith.constant dense<0.000000e+00> : vector<128x128xf32>
    %2 = tpu.matmul %0, %1, %cst {dimension_numbers = #tpu.dot_dimension_numbers<[1], [0], [0], [1], [0, 0, 1, 1], [], []>} : vector<128x128xf32>, vector<128x128xf32>, vector<128x128xf32> -> vector<128x128xf32>
    %c0_i32 = arith.constant 0 : i32
    %3 = arith.cmpi eq, %arg0, %c0_i32 : i32
    %4 = arith.extui %3 : i1 to i32
    %c0_i32_3 = arith.constant 0 : i32
    %5 = arith.cmpi ne, %4, %c0_i32_3 : i32
    scf.if %5 {
      %c0_i32_8 = arith.constant 0 : i32
      %14 = arith.cmpi eq, %arg1, %c0_i32_8 : i32
      %15 = arith.extui %14 : i1 to i32
      %c0_i32_9 = arith.constant 0 : i32
      %16 = arith.cmpi ne, %15, %c0_i32_9 : i32
      scf.if %16 {
        %cst_20 = arith.constant 0.000000e+00 : f32
        %28 = vector.broadcast %cst_20 : f32 to vector<1x128xf32>
        %c0_21 = arith.constant 0 : index
        %c0_22 = arith.constant 0 : index
        %29 = vector.load %arg7[%c0_21, %c0_22] : memref<1x128xf32, #tpu.memory_space<vmem>>, vector<1x128xf32>
        tpu.vector_store %arg7[%c0_21, %c0_22], %28 {strides = array<i32>} : memref<1x128xf32, #tpu.memory_space<vmem>>, vector<1x128xf32>,
        %cst_23 = arith.constant 0.000000e+00 : f32
        %30 = vector.broadcast %cst_23 : f32 to vector<1x128xf32>
        %c0_24 = arith.constant 0 : index
        %c0_25 = arith.constant 0 : index
        %31 = vector.load %arg8[%c0_24, %c0_25] : memref<1x128xf32, #tpu.memory_space<vmem>>, vector<1x128xf32>
        tpu.vector_store %arg8[%c0_24, %c0_25], %30 {strides = array<i32>} : memref<1x128xf32, #tpu.memory_space<vmem>>, vector<1x128xf32>,
      } else {
      }
      %c0_10 = arith.constant 0 : index
      %c0_11 = arith.constant 0 : index
      %17 = vector.load %arg7[%c0_10, %c0_11] : memref<1x128xf32, #tpu.memory_space<vmem>>, vector<1x128xf32>
      %cst_12 = arith.constant dense<0.000000e+00> : vector<128xf32>
      %18 = vector.multi_reduction <add>, %2, %cst_12 [0] : vector<128x128xf32> to vector<128xf32>
      %19 = vector.shape_cast %18 : vector<128xf32> to vector<1x128xf32>
      %20 = arith.addf %17, %19 : vector<1x128xf32>
      %c0_13 = arith.constant 0 : index
      %c0_14 = arith.constant 0 : index
      %21 = vector.load %arg7[%c0_13, %c0_14] : memref<1x128xf32, #tpu.memory_space<vmem>>, vector<1x128xf32>
      tpu.vector_store %arg7[%c0_13, %c0_14], %20 {strides = array<i32>} : memref<1x128xf32, #tpu.memory_space<vmem>>, vector<1x128xf32>,
      %c0_15 = arith.constant 0 : index
      %c0_16 = arith.constant 0 : index
      %22 = vector.load %arg8[%c0_15, %c0_16] : memref<1x128xf32, #tpu.memory_space<vmem>>, vector<1x128xf32>
      %23 = arith.mulf %2, %2 : vector<128x128xf32>
      %cst_17 = arith.constant dense<0.000000e+00> : vector<128xf32>
      %24 = vector.multi_reduction <add>, %23, %cst_17 [0] : vector<128x128xf32> to vector<128xf32>
      %25 = vector.shape_cast %24 : vector<128xf32> to vector<1x128xf32>
      %26 = arith.addf %22, %25 : vector<1x128xf32>
      %c0_18 = arith.constant 0 : index
      %c0_19 = arith.constant 0 : index
      %27 = vector.load %arg8[%c0_18, %c0_19] : memref<1x128xf32, #tpu.memory_space<vmem>>, vector<1x128xf32>
      tpu.vector_store %arg8[%c0_18, %c0_19], %26 {strides = array<i32>} : memref<1x128xf32, #tpu.memory_space<vmem>>, vector<1x128xf32>,
    } else {
    }
    %c1_i32 = arith.constant 1 : i32
    %6 = arith.cmpi eq, %arg0, %c1_i32 : i32
    %c0_i32_4 = arith.constant 0 : i32
    %7 = arith.cmpi eq, %arg1, %c0_i32_4 : i32
    %8 = arith.andi %6, %7 : i1
    %9 = arith.extui %8 : i1 to i32
    %c0_i32_5 = arith.constant 0 : i32
    %10 = arith.cmpi ne, %9, %c0_i32_5 : i32
    scf.if %10 {
      %c0_8 = arith.constant 0 : index
      %c0_9 = arith.constant 0 : index
      %14 = vector.load %arg7[%c0_8, %c0_9] : memref<1x128xf32, #tpu.memory_space<vmem>>, vector<1x128xf32>
      %cst_10 = arith.constant 7.812500e-03 : f32
      %15 = vector.broadcast %cst_10 : f32 to vector<1x128xf32>
      %16 = arith.mulf %14, %15 : vector<1x128xf32>
      %c0_11 = arith.constant 0 : index
      %c0_12 = arith.constant 0 : index
      %17 = vector.load %arg8[%c0_11, %c0_12] : memref<1x128xf32, #tpu.memory_space<vmem>>, vector<1x128xf32>
      %cst_13 = arith.constant 7.812500e-03 : f32
      %18 = vector.broadcast %cst_13 : f32 to vector<1x128xf32>
      %19 = arith.mulf %17, %18 : vector<1x128xf32>
      %20 = arith.mulf %16, %16 : vector<1x128xf32>
      %21 = arith.subf %19, %20 : vector<1x128xf32>
      %cst_14 = arith.constant 0.000000e+00 : f32
      %22 = vector.broadcast %cst_14 : f32 to vector<1x128xf32>
      %23 = arith.maximumf %21, %22 : vector<1x128xf32>
      %c0_15 = arith.constant 0 : index
      %c0_16 = arith.constant 0 : index
      %24 = vector.load %arg4[%c0_15, %c0_16] : memref<1x128xf32, #tpu.memory_space<vmem>>, vector<1x128xf32>
      %cst_17 = arith.constant 9.99999974E-6 : f32
      %25 = vector.broadcast %cst_17 : f32 to vector<1x128xf32>
      %26 = arith.addf %23, %25 : vector<1x128xf32>
      %27 = math.rsqrt %26 : vector<1x128xf32>
      %28 = arith.mulf %24, %27 : vector<1x128xf32>
      %c0_18 = arith.constant 0 : index
      %c0_19 = arith.constant 0 : index
      %29 = vector.load %arg5[%c0_18, %c0_19] : memref<1x128xf32, #tpu.memory_space<vmem>>, vector<1x128xf32>
      %30 = arith.mulf %16, %28 : vector<1x128xf32>
      %31 = arith.subf %29, %30 : vector<1x128xf32>
      %c0_20 = arith.constant 0 : index
      %c0_21 = arith.constant 0 : index
      %32 = vector.load %arg7[%c0_20, %c0_21] : memref<1x128xf32, #tpu.memory_space<vmem>>, vector<1x128xf32>
      tpu.vector_store %arg7[%c0_20, %c0_21], %28 {strides = array<i32>} : memref<1x128xf32, #tpu.memory_space<vmem>>, vector<1x128xf32>,
      %c0_22 = arith.constant 0 : index
      %c0_23 = arith.constant 0 : index
      %33 = vector.load %arg8[%c0_22, %c0_23] : memref<1x128xf32, #tpu.memory_space<vmem>>, vector<1x128xf32>
      tpu.vector_store %arg8[%c0_22, %c0_23], %31 {strides = array<i32>} : memref<1x128xf32, #tpu.memory_space<vmem>>, vector<1x128xf32>,
    } else {
    }
    %c1_i32_6 = arith.constant 1 : i32
    %11 = arith.cmpi eq, %arg0, %c1_i32_6 : i32
    %12 = arith.extui %11 : i1 to i32
    %c0_i32_7 = arith.constant 0 : i32
    %13 = arith.cmpi ne, %12, %c0_i32_7 : i32
    scf.if %13 {
      %c0_8 = arith.constant 0 : index
      %c0_9 = arith.constant 0 : index
      %14 = vector.load %arg7[%c0_8, %c0_9] : memref<1x128xf32, #tpu.memory_space<vmem>>, vector<1x128xf32>
      %15 = vector.broadcast %14 : vector<1x128xf32> to vector<128x128xf32>
      %16 = arith.mulf %2, %15 : vector<128x128xf32>
      %c0_10 = arith.constant 0 : index
      %c0_11 = arith.constant 0 : index
      %17 = vector.load %arg8[%c0_10, %c0_11] : memref<1x128xf32, #tpu.memory_space<vmem>>, vector<1x128xf32>
      %18 = vector.broadcast %17 : vector<1x128xf32> to vector<128x128xf32>
      %19 = arith.addf %16, %18 : vector<128x128xf32>
      %cst_12 = arith.constant 0.000000e+00 : f32
      %20 = vector.broadcast %cst_12 : f32 to vector<128x128xf32>
      %21 = arith.maximumf %19, %20 : vector<128x128xf32>
      %c0_13 = arith.constant 0 : index
      %c0_14 = arith.constant 0 : index
      %22 = vector.load %arg6[%c0_13, %c0_14] : memref<128x128xf32, #tpu.memory_space<vmem>>, vector<128x128xf32>
      tpu.vector_store %arg6[%c0_13, %c0_14], %21 {strides = array<i32>} : memref<128x128xf32, #tpu.memory_space<vmem>>, vector<128x128xf32>,
    } else {
    }
    return
  }
  func.func @transform_0(%arg0: i32, %arg1: i32) -> (i32, i32) {
    %c0_i32 = arith.constant 0 : i32
    %c0_i32_0 = arith.constant 0 : i32
    return %arg1, %c0_i32 : i32, i32
  }
  func.func @transform_1(%arg0: i32, %arg1: i32) -> (i32, i32) {
    %c0_i32 = arith.constant 0 : i32
    %c0_i32_0 = arith.constant 0 : i32
    %c0_i32_1 = arith.constant 0 : i32
    return %c0_i32, %c0_i32_0 : i32, i32
  }
  func.func @transform_2(%arg0: i32, %arg1: i32) -> (i32, i32) {
    %c0_i32 = arith.constant 0 : i32
    %c0_i32_0 = arith.constant 0 : i32
    %c0_i32_1 = arith.constant 0 : i32
    return %c0_i32, %c0_i32_0 : i32, i32
  }
  func.func @transform_3(%arg0: i32, %arg1: i32) -> (i32, i32) {
    %c0_i32 = arith.constant 0 : i32
    %c0_i32_0 = arith.constant 0 : i32
    %c0_i32_1 = arith.constant 0 : i32
    return %c0_i32, %c0_i32_0 : i32, i32
  }
  func.func @transform_4(%arg0: i32, %arg1: i32) -> (i32, i32) {
    %0 = arith.muli %arg1, %arg0 : i32
    %c0_i32 = arith.constant 0 : i32
    %c0_i32_0 = arith.constant 0 : i32
    return %0, %c0_i32 : i32, i32
  }
}

module attributes {stable_mosaic.version = 11 : i64} {
  func.func @_conv_bn_relu_proj_kernel(%arg0: i32, %arg1: i32, %arg2: memref<112x256xf32, #tpu.memory_space<vmem>>, %arg3: memref<256x128xf32, #tpu.memory_space<vmem>>, %arg4: memref<1x128xf32, #tpu.memory_space<vmem>>, %arg5: memref<1x128xf32, #tpu.memory_space<vmem>>, %arg6: memref<128x128xf32, #tpu.memory_space<vmem>>, %arg7: memref<1x128xf32, #tpu.memory_space<vmem>>, %arg8: memref<112x128xf32, #tpu.memory_space<vmem>>, %arg9: memref<1x128xf32, #tpu.memory_space<vmem>>, %arg10: memref<1x128xf32, #tpu.memory_space<vmem>>) attributes {dimension_semantics = [#tpu.dimension_semantics<arbitrary>, #tpu.dimension_semantics<arbitrary>], iteration_bounds = array<i64: 2, 1>, scalar_prefetch = 0 : i64, scratch_operands = 2 : i64, tpu.core_type = #tpu.core_type<tc>, window_params = [{transform_indices = @transform_0, window_bounds = array<i64: 112, 256>}, {pipeline_mode = #tpu.pipeline_mode<synchronous>, transform_indices = @transform_1, window_bounds = array<i64: 256, 128>}, {pipeline_mode = #tpu.pipeline_mode<synchronous>, transform_indices = @transform_2, window_bounds = array<i64: 1, 128>}, {pipeline_mode = #tpu.pipeline_mode<synchronous>, transform_indices = @transform_3, window_bounds = array<i64: 1, 128>}, {pipeline_mode = #tpu.pipeline_mode<synchronous>, transform_indices = @transform_4, window_bounds = array<i64: 128, 128>}, {pipeline_mode = #tpu.pipeline_mode<synchronous>, transform_indices = @transform_5, window_bounds = array<i64: 1, 128>}, {transform_indices = @transform_6, window_bounds = array<i64: 112, 128>}]} {
    %c0 = arith.constant 0 : index
    %c0_0 = arith.constant 0 : index
    %0 = vector.load %arg2[%c0, %c0_0] : memref<112x256xf32, #tpu.memory_space<vmem>>, vector<112x256xf32>
    %c0_1 = arith.constant 0 : index
    %c0_2 = arith.constant 0 : index
    %1 = vector.load %arg3[%c0_1, %c0_2] : memref<256x128xf32, #tpu.memory_space<vmem>>, vector<256x128xf32>
    %cst = arith.constant dense<0.000000e+00> : vector<112x128xf32>
    %2 = tpu.matmul %0, %1, %cst {dimension_numbers = #tpu.dot_dimension_numbers<[1], [0], [0], [1], [0, 0, 1, 1], [], []>} : vector<112x256xf32>, vector<256x128xf32>, vector<112x128xf32> -> vector<112x128xf32>
    %c0_i32 = arith.constant 0 : i32
    %3 = arith.cmpi eq, %arg0, %c0_i32 : i32
    %4 = arith.extui %3 : i1 to i32
    %c0_i32_3 = arith.constant 0 : i32
    %5 = arith.cmpi ne, %4, %c0_i32_3 : i32
    scf.if %5 {
      %c0_i32_8 = arith.constant 0 : i32
      %14 = arith.cmpi eq, %arg1, %c0_i32_8 : i32
      %15 = arith.extui %14 : i1 to i32
      %c0_i32_9 = arith.constant 0 : i32
      %16 = arith.cmpi ne, %15, %c0_i32_9 : i32
      scf.if %16 {
        %cst_20 = arith.constant 0.000000e+00 : f32
        %28 = vector.broadcast %cst_20 : f32 to vector<1x128xf32>
        %c0_21 = arith.constant 0 : index
        %c0_22 = arith.constant 0 : index
        %29 = vector.load %arg9[%c0_21, %c0_22] : memref<1x128xf32, #tpu.memory_space<vmem>>, vector<1x128xf32>
        tpu.vector_store %arg9[%c0_21, %c0_22], %28 {strides = array<i32>} : memref<1x128xf32, #tpu.memory_space<vmem>>, vector<1x128xf32>,
        %cst_23 = arith.constant 0.000000e+00 : f32
        %30 = vector.broadcast %cst_23 : f32 to vector<1x128xf32>
        %c0_24 = arith.constant 0 : index
        %c0_25 = arith.constant 0 : index
        %31 = vector.load %arg10[%c0_24, %c0_25] : memref<1x128xf32, #tpu.memory_space<vmem>>, vector<1x128xf32>
        tpu.vector_store %arg10[%c0_24, %c0_25], %30 {strides = array<i32>} : memref<1x128xf32, #tpu.memory_space<vmem>>, vector<1x128xf32>,
      } else {
      }
      %c0_10 = arith.constant 0 : index
      %c0_11 = arith.constant 0 : index
      %17 = vector.load %arg9[%c0_10, %c0_11] : memref<1x128xf32, #tpu.memory_space<vmem>>, vector<1x128xf32>
      %cst_12 = arith.constant dense<0.000000e+00> : vector<128xf32>
      %18 = vector.multi_reduction <add>, %2, %cst_12 [0] : vector<112x128xf32> to vector<128xf32>
      %19 = vector.shape_cast %18 : vector<128xf32> to vector<1x128xf32>
      %20 = arith.addf %17, %19 : vector<1x128xf32>
      %c0_13 = arith.constant 0 : index
      %c0_14 = arith.constant 0 : index
      %21 = vector.load %arg9[%c0_13, %c0_14] : memref<1x128xf32, #tpu.memory_space<vmem>>, vector<1x128xf32>
      tpu.vector_store %arg9[%c0_13, %c0_14], %20 {strides = array<i32>} : memref<1x128xf32, #tpu.memory_space<vmem>>, vector<1x128xf32>,
      %c0_15 = arith.constant 0 : index
      %c0_16 = arith.constant 0 : index
      %22 = vector.load %arg10[%c0_15, %c0_16] : memref<1x128xf32, #tpu.memory_space<vmem>>, vector<1x128xf32>
      %23 = arith.mulf %2, %2 : vector<112x128xf32>
      %cst_17 = arith.constant dense<0.000000e+00> : vector<128xf32>
      %24 = vector.multi_reduction <add>, %23, %cst_17 [0] : vector<112x128xf32> to vector<128xf32>
      %25 = vector.shape_cast %24 : vector<128xf32> to vector<1x128xf32>
      %26 = arith.addf %22, %25 : vector<1x128xf32>
      %c0_18 = arith.constant 0 : index
      %c0_19 = arith.constant 0 : index
      %27 = vector.load %arg10[%c0_18, %c0_19] : memref<1x128xf32, #tpu.memory_space<vmem>>, vector<1x128xf32>
      tpu.vector_store %arg10[%c0_18, %c0_19], %26 {strides = array<i32>} : memref<1x128xf32, #tpu.memory_space<vmem>>, vector<1x128xf32>,
    } else {
    }
    %c1_i32 = arith.constant 1 : i32
    %6 = arith.cmpi eq, %arg0, %c1_i32 : i32
    %c0_i32_4 = arith.constant 0 : i32
    %7 = arith.cmpi eq, %arg1, %c0_i32_4 : i32
    %8 = arith.andi %6, %7 : i1
    %9 = arith.extui %8 : i1 to i32
    %c0_i32_5 = arith.constant 0 : i32
    %10 = arith.cmpi ne, %9, %c0_i32_5 : i32
    scf.if %10 {
      %c0_8 = arith.constant 0 : index
      %c0_9 = arith.constant 0 : index
      %14 = vector.load %arg9[%c0_8, %c0_9] : memref<1x128xf32, #tpu.memory_space<vmem>>, vector<1x128xf32>
      %cst_10 = arith.constant 0.0102040814 : f32
      %15 = vector.broadcast %cst_10 : f32 to vector<1x128xf32>
      %16 = arith.mulf %14, %15 : vector<1x128xf32>
      %c0_11 = arith.constant 0 : index
      %c0_12 = arith.constant 0 : index
      %17 = vector.load %arg10[%c0_11, %c0_12] : memref<1x128xf32, #tpu.memory_space<vmem>>, vector<1x128xf32>
      %cst_13 = arith.constant 0.0102040814 : f32
      %18 = vector.broadcast %cst_13 : f32 to vector<1x128xf32>
      %19 = arith.mulf %17, %18 : vector<1x128xf32>
      %20 = arith.mulf %16, %16 : vector<1x128xf32>
      %21 = arith.subf %19, %20 : vector<1x128xf32>
      %cst_14 = arith.constant 0.000000e+00 : f32
      %22 = vector.broadcast %cst_14 : f32 to vector<1x128xf32>
      %23 = arith.maximumf %21, %22 : vector<1x128xf32>
      %c0_15 = arith.constant 0 : index
      %c0_16 = arith.constant 0 : index
      %24 = vector.load %arg4[%c0_15, %c0_16] : memref<1x128xf32, #tpu.memory_space<vmem>>, vector<1x128xf32>
      %cst_17 = arith.constant 9.99999974E-6 : f32
      %25 = vector.broadcast %cst_17 : f32 to vector<1x128xf32>
      %26 = arith.addf %23, %25 : vector<1x128xf32>
      %27 = math.rsqrt %26 : vector<1x128xf32>
      %28 = arith.mulf %24, %27 : vector<1x128xf32>
      %c0_18 = arith.constant 0 : index
      %c0_19 = arith.constant 0 : index
      %29 = vector.load %arg5[%c0_18, %c0_19] : memref<1x128xf32, #tpu.memory_space<vmem>>, vector<1x128xf32>
      %30 = arith.mulf %16, %28 : vector<1x128xf32>
      %31 = arith.subf %29, %30 : vector<1x128xf32>
      %c0_20 = arith.constant 0 : index
      %c0_21 = arith.constant 0 : index
      %32 = vector.load %arg9[%c0_20, %c0_21] : memref<1x128xf32, #tpu.memory_space<vmem>>, vector<1x128xf32>
      tpu.vector_store %arg9[%c0_20, %c0_21], %28 {strides = array<i32>} : memref<1x128xf32, #tpu.memory_space<vmem>>, vector<1x128xf32>,
      %c0_22 = arith.constant 0 : index
      %c0_23 = arith.constant 0 : index
      %33 = vector.load %arg10[%c0_22, %c0_23] : memref<1x128xf32, #tpu.memory_space<vmem>>, vector<1x128xf32>
      tpu.vector_store %arg10[%c0_22, %c0_23], %31 {strides = array<i32>} : memref<1x128xf32, #tpu.memory_space<vmem>>, vector<1x128xf32>,
    } else {
    }
    %c1_i32_6 = arith.constant 1 : i32
    %11 = arith.cmpi eq, %arg0, %c1_i32_6 : i32
    %12 = arith.extui %11 : i1 to i32
    %c0_i32_7 = arith.constant 0 : i32
    %13 = arith.cmpi ne, %12, %c0_i32_7 : i32
    scf.if %13 {
      %c0_8 = arith.constant 0 : index
      %c0_9 = arith.constant 0 : index
      %14 = vector.load %arg9[%c0_8, %c0_9] : memref<1x128xf32, #tpu.memory_space<vmem>>, vector<1x128xf32>
      %15 = vector.broadcast %14 : vector<1x128xf32> to vector<112x128xf32>
      %16 = arith.mulf %2, %15 : vector<112x128xf32>
      %c0_10 = arith.constant 0 : index
      %c0_11 = arith.constant 0 : index
      %17 = vector.load %arg10[%c0_10, %c0_11] : memref<1x128xf32, #tpu.memory_space<vmem>>, vector<1x128xf32>
      %18 = vector.broadcast %17 : vector<1x128xf32> to vector<112x128xf32>
      %19 = arith.addf %16, %18 : vector<112x128xf32>
      %cst_12 = arith.constant 0.000000e+00 : f32
      %20 = vector.broadcast %cst_12 : f32 to vector<112x128xf32>
      %21 = arith.maximumf %19, %20 : vector<112x128xf32>
      %c0_13 = arith.constant 0 : index
      %c0_14 = arith.constant 0 : index
      %22 = vector.load %arg6[%c0_13, %c0_14] : memref<128x128xf32, #tpu.memory_space<vmem>>, vector<128x128xf32>
      %cst_15 = arith.constant dense<0.000000e+00> : vector<112x128xf32>
      %23 = tpu.matmul %21, %22, %cst_15 {dimension_numbers = #tpu.dot_dimension_numbers<[1], [0], [0], [1], [0, 0, 1, 1], [], []>} : vector<112x128xf32>, vector<128x128xf32>, vector<112x128xf32> -> vector<112x128xf32>
      %c0_16 = arith.constant 0 : index
      %c0_17 = arith.constant 0 : index
      %24 = vector.load %arg7[%c0_16, %c0_17] : memref<1x128xf32, #tpu.memory_space<vmem>>, vector<1x128xf32>
      %25 = vector.broadcast %24 : vector<1x128xf32> to vector<112x128xf32>
      %26 = arith.addf %23, %25 : vector<112x128xf32>
      %c0_18 = arith.constant 0 : index
      %c0_19 = arith.constant 0 : index
      %27 = vector.load %arg8[%c0_18, %c0_19] : memref<112x128xf32, #tpu.memory_space<vmem>>, vector<112x128xf32>
      tpu.vector_store %arg8[%c0_18, %c0_19], %26 {strides = array<i32>} : memref<112x128xf32, #tpu.memory_space<vmem>>, vector<112x128xf32>,
    } else {
    }
    return
  }
  func.func @transform_0(%arg0: i32, %arg1: i32) -> (i32, i32) {
    %c0_i32 = arith.constant 0 : i32
    %c0_i32_0 = arith.constant 0 : i32
    return %arg1, %c0_i32 : i32, i32
  }
  func.func @transform_1(%arg0: i32, %arg1: i32) -> (i32, i32) {
    %c0_i32 = arith.constant 0 : i32
    %c0_i32_0 = arith.constant 0 : i32
    %c0_i32_1 = arith.constant 0 : i32
    return %c0_i32, %c0_i32_0 : i32, i32
  }
  func.func @transform_2(%arg0: i32, %arg1: i32) -> (i32, i32) {
    %c0_i32 = arith.constant 0 : i32
    %c0_i32_0 = arith.constant 0 : i32
    %c0_i32_1 = arith.constant 0 : i32
    return %c0_i32, %c0_i32_0 : i32, i32
  }
  func.func @transform_3(%arg0: i32, %arg1: i32) -> (i32, i32) {
    %c0_i32 = arith.constant 0 : i32
    %c0_i32_0 = arith.constant 0 : i32
    %c0_i32_1 = arith.constant 0 : i32
    return %c0_i32, %c0_i32_0 : i32, i32
  }
  func.func @transform_4(%arg0: i32, %arg1: i32) -> (i32, i32) {
    %c0_i32 = arith.constant 0 : i32
    %c0_i32_0 = arith.constant 0 : i32
    %c0_i32_1 = arith.constant 0 : i32
    return %c0_i32, %c0_i32_0 : i32, i32
  }
  func.func @transform_5(%arg0: i32, %arg1: i32) -> (i32, i32) {
    %c0_i32 = arith.constant 0 : i32
    %c0_i32_0 = arith.constant 0 : i32
    %c0_i32_1 = arith.constant 0 : i32
    return %c0_i32, %c0_i32_0 : i32, i32
  }
  func.func @transform_6(%arg0: i32, %arg1: i32) -> (i32, i32) {
    %0 = arith.muli %arg1, %arg0 : i32
    %c0_i32 = arith.constant 0 : i32
    %c0_i32_0 = arith.constant 0 : i32
    return %0, %c0_i32 : i32, i32
  }
}

</mosaic_0001>

<bundles_post_ra>
// kernel: encoder_forward.2
= control target key start
LH: loop header
LB: loop body
LE: loop exit
PB: predicated region body
PF: predicated region fallthrough
CT: control target
= control target key end

     0   :  { %s706_s15 = smov 0   ;;  %s708_s16 = smov 0   ;;  %s984_s0 = inlined_call_operand.vmem [shape: f32[128,128], index: 0, kind: input, shape index: {}]   ;;  %s985_s1 = inlined_call_operand.vmem [shape: f32[128,128], index: 1, kind: input, shape index: {}]   ;;  %s986_s2 = inlined_call_operand.vmem [shape: f32[1,128], index: 2, kind: input, shape index: {}]   ;;  %s987_s3 = inlined_call_operand.vmem [shape: f32[1,128], index: 3, kind: input, shape index: {}]   ;;  %s988_s4 = inlined_call_operand.vmem [shape: f32[128,128], index: 4, kind: output, shape index: {}]  }
   0x1   :  { %s710_s17 = smov 0  }
   0x2 LB: > { %s26_s18 = sadd.s32 1, %s674_s16  ;;  %p570_p0 = scmp.ge.s32.totalorder %s678_s17, 1  ;;  %s678_s17 = sphi %s710_s17, %s14_s17   ;;  %s674_s16 = sphi %s708_s16, %s990_s16   ;;  %s670_s15 = sphi %s706_s15, %s989_s15  }
   0x3   : > { %p28_p1 = scmp.ge.s32.totalorder %s26_s18, 2  ;;  %p177_p2 = scmp.lt.s32.totalorder %s678_s17, 3 }
   0x5   : > { %s992_s18 = smov (%p28_p1, %s26_s18), 0  ;;  %p178_p3 = pnand %p570_p0, %p177_p2 }
   0x6   : > { %p571_p4 = scmp.ne.s32.totalorder (!%p178_p3), %s670_s15, 0 }
   0x7   : > { %181 = sbr.rel (%p178_p3) target bundleno = 317 (0x13d), region = 36 }
   0xc   : > { %v249_v0 = vld [vmem:[%s985_s1 + $0x78] sm:$0xff]  ;;  %v248_v1 = vld [vmem:[%s985_s1 + $0x70] sm:$0xff]  ;;  %v247_v2 = vld [vmem:[%s985_s1 + $0x68] sm:$0xff] }
   0xd   : > { %580 = vmatpush.msra.mxu2 %v249_v0  ;;  %581 = vmatpush.msra.mxu3 %v249_v0  ;;  %v246_v3 = vld [vmem:[%s985_s1 + $0x60] sm:$0xff]  ;;  %v245_v4 = vld [vmem:[%s985_s1 + $0x58] sm:$0xff]  ;;  %v244_v5 = vld [vmem:[%s985_s1 + $0x50] sm:$0xff] }
   0xe   : > { %250 = vmatpush.msra.mxu0 %v249_v0  ;;  %579 = vmatpush.msra.mxu1 %v249_v0  ;;  %v243_v6 = vld [vmem:[%s985_s1 + $0x48] sm:$0xff]  ;;  %v242_v7 = vld [vmem:[%s985_s1 + $0x40] sm:$0xff]  ;;  %v241_v8 = vld [vmem:[%s985_s1 + $0x38] sm:$0xff] }
   0xf   : > { %583 = vmatpush.msra.mxu2 %v248_v1  ;;  %584 = vmatpush.msra.mxu3 %v248_v1  ;;  %v240_v9 = vld [vmem:[%s985_s1 + $0x30] sm:$0xff]  ;;  %v239_v10 = vld [vmem:[%s985_s1 + $0x28] sm:$0xff]  ;;  %v238_v11 = vld [vmem:[%s985_s1 + $0x20] sm:$0xff] }
  0x10   : > { %251 = vmatpush.msra.mxu0 %v248_v1  ;;  %582 = vmatpush.msra.mxu1 %v248_v1  ;;  %v237_v12 = vld [vmem:[%s985_s1 + $0x18] sm:$0xff]  ;;  %v236_v13 = vld [vmem:[%s985_s1 + $0x10] sm:$0xff]  ;;  %v235_v14 = vld [vmem:[%s985_s1 + $0x8] sm:$0xff] }
  0x11   : > { %586 = vmatpush.msra.mxu2 %v247_v2  ;;  %587 = vmatpush.msra.mxu3 %v247_v2  ;;  %v234_v15 = vld [vmem:[%s985_s1] sm:$0xff]  ;;  %v227_v20 = vld [vmem:[%s984_s0 + $0x48] sm:$0xff]  ;;  %v228_v24 = vld [vmem:[%s984_s0 + $0x50] sm:$0xff] }
  0x12   : > { %252 = vmatpush.msra.mxu0 %v247_v2  ;;  %585 = vmatpush.msra.mxu1 %v247_v2  ;;  %v226_v16 = vld [vmem:[%s984_s0 + $0x40] sm:$0xff]  ;;  %v231_v21 = vld [vmem:[%s984_s0 + $0x68] sm:$0xff]  ;;  %v232_v25 = vld [vmem:[%s984_s0 + $0x70] sm:$0xff] }
  0x13   : > { %589 = vmatpush.msra.mxu2 %v246_v3  ;;  %590 = vmatpush.msra.mxu3 %v246_v3  ;;  %v230_v17 = vld [vmem:[%s984_s0 + $0x60] sm:$0xff]  ;;  %v219_v22 = vld [vmem:[%s984_s0 + $0x8] sm:$0xff]  ;;  %v220_v26 = vld [vmem:[%s984_s0 + $0x10] sm:$0xff] }
  0x14   : > { %253 = vmatpush.msra.mxu0 %v246_v3  ;;  %588 = vmatpush.msra.mxu1 %v246_v3  ;;  %v218_v18 = vld [vmem:[%s984_s0] sm:$0xff]  ;;  %v223_v23 = vld [vmem:[%s984_s0 + $0x28] sm:$0xff]  ;;  %v224_v27 = vld [vmem:[%s984_s0 + $0x30] sm:$0xff] }
  0x15   : > { %592 = vmatpush.msra.mxu2 %v245_v4  ;;  %593 = vmatpush.msra.mxu3 %v245_v4  ;;  %v222_v19 = vld [vmem:[%s984_s0 + $0x20] sm:$0xff]  ;;  %v229_v28 = vld [vmem:[%s984_s0 + $0x58] sm:$0xff] }
  0x16   : > { %254 = vmatpush.msra.mxu0 %v245_v4  ;;  %591 = vmatpush.msra.mxu1 %v245_v4  ;;  %v233_v29 = vld [vmem:[%s984_s0 + $0x78] sm:$0xff] }
  0x17   : > { %595 = vmatpush.msra.mxu2 %v244_v5  ;;  %596 = vmatpush.msra.mxu3 %v244_v5  ;;  %v221_v30 = vld [vmem:[%s984_s0 + $0x18] sm:$0xff] }
  0x18   : > { %255 = vmatpush.msra.mxu0 %v244_v5  ;;  %594 = vmatpush.msra.mxu1 %v244_v5  ;;  %v225_v31 = vld [vmem:[%s984_s0 + $0x38] sm:$0xff] }
  0x19   : > { %598 = vmatpush.msra.mxu2 %v243_v6  ;;  %599 = vmatpush.msra.mxu3 %v243_v6 }
  0x1a   : > { %256 = vmatpush.msra.mxu0 %v243_v6  ;;  %597 = vmatpush.msra.mxu1 %v243_v6 }
  0x1b   : > { %601 = vmatpush.msra.mxu2 %v242_v7  ;;  %602 = vmatpush.msra.mxu3 %v242_v7 }
  0x1c   : > { %257 = vmatpush.msra.mxu0 %v242_v7  ;;  %600 = vmatpush.msra.mxu1 %v242_v7 }
  0x1d   : > { %604 = vmatpush.msra.mxu2 %v241_v8  ;;  %605 = vmatpush.msra.mxu3 %v241_v8 }
  0x1e   : > { %258 = vmatpush.msra.mxu0 %v241_v8  ;;  %603 = vmatpush.msra.mxu1 %v241_v8 }
  0x1f   : > { %607 = vmatpush.msra.mxu2 %v240_v9  ;;  %608 = vmatpush.msra.mxu3 %v240_v9 }
  0x20   : > { %259 = vmatpush.msra.mxu0 %v240_v9  ;;  %606 = vmatpush.msra.mxu1 %v240_v9 }
  0x21   : > { %610 = vmatpush.msra.mxu2 %v239_v10  ;;  %611 = vmatpush.msra.mxu3 %v239_v10 }
  0x22   : > { %260 = vmatpush.msra.mxu0 %v239_v10  ;;  %609 = vmatpush.msra.mxu1 %v239_v10 }
  0x23   : > { %613 = vmatpush.msra.mxu2 %v238_v11  ;;  %614 = vmatpush.msra.mxu3 %v238_v11 }
  0x24   : > { %261 = vmatpush.msra.mxu0 %v238_v11  ;;  %612 = vmatpush.msra.mxu1 %v238_v11 }
  0x25   : > { %616 = vmatpush.msra.mxu2 %v237_v12  ;;  %617 = vmatpush.msra.mxu3 %v237_v12 }
  0x26   : > { %262 = vmatpush.msra.mxu0 %v237_v12  ;;  %615 = vmatpush.msra.mxu1 %v237_v12 }
  0x27   : > { %619 = vmatpush.msra.mxu2 %v236_v13  ;;  %620 = vmatpush.msra.mxu3 %v236_v13 }
  0x28   : > { %263 = vmatpush.msra.mxu0 %v236_v13  ;;  %618 = vmatpush.msra.mxu1 %v236_v13 }
  0x29   : > { %622 = vmatpush.msra.mxu2 %v235_v14  ;;  %623 = vmatpush.msra.mxu3 %v235_v14 }
  0x2a   : > { %264 = vmatpush.msra.mxu0 %v235_v14  ;;  %621 = vmatpush.msra.mxu1 %v235_v14 }
  0x2b   : > { %625 = vmatpush.msra.mxu2 %v234_v15  ;;  %626 = vmatpush.msra.mxu3 %v234_v15 }
  0x2c   : > { %290 = vmatmul.f32.vlgmr.msra.gmra.mxu2 %v226_v16  ;;  %302 = vmatmul.f32.vlgmr.msra.gmra.mxu3 %v230_v17 }
  0x2d   : > { %265 = vmatpush.msra.mxu0 %v234_v15  ;;  %624 = vmatpush.msra.mxu1 %v234_v15 }
  0x2e   : > { %266 = vmatmul.f32.vlgmr.msra.gmra.mxu0 %v218_v18  ;;  %278 = vmatmul.f32.vlgmr.msra.gmra.mxu1 %v222_v19 }
  0x34   : > { %293 = vmatmul.f32.gmra.mxu2 %v227_v20  ;;  %305 = vmatmul.f32.gmra.mxu3 %v231_v21 }
  0x36   : > { %269 = vmatmul.f32.gmra.mxu0 %v219_v22  ;;  %281 = vmatmul.f32.gmra.mxu1 %v223_v23 }
  0x3c   : > { %296 = vmatmul.f32.gmra.mxu2 %v228_v24  ;;  %308 = vmatmul.f32.gmra.mxu3 %v232_v25 }
  0x3e   : > { %272 = vmatmul.f32.gmra.mxu0 %v220_v26  ;;  %284 = vmatmul.f32.gmra.mxu1 %v224_v27 }
  0x44   : > { %299 = vmatmul.f32.gmra.mxu2 %v229_v28  ;;  %311 = vmatmul.f32.gmra.mxu3 %v233_v29 }
  0x46   : > { %275 = vmatmul.f32.gmra.mxu0 %v221_v30  ;;  %287 = vmatmul.f32.gmra.mxu1 %v225_v31 }
  0xab   : > { %v822_v32 = vpop.f32.mrf.mxu0  ;;  %v824_v33 = vpop.f32.mrf.mxu1 }
  0xaf   : > { %v826_v34 = vpop.f32.mrf.mxu2  ;;  %v828_v35 = vpop.f32.mrf.mxu3 }
  0xb3   : > { %v830_v36 = vpop.f32.mrf.mxu0  ;;  %v832_v37 = vpop.f32.mrf.mxu1 }
  0xb7   : > { %v834_v38 = vpop.f32.mrf.mxu2  ;;  %v836_v39 = vpop.f32.mrf.mxu3 }
  0xbb   : > { %v838_v40 = vpop.f32.mrf.mxu0  ;;  %v840_v41 = vpop.f32.mrf.mxu1 }
  0xbf   : > { %v842_v42 = vpop.f32.mrf.mxu2  ;;  %v844_v43 = vpop.f32.mrf.mxu3 }
  0xc3   : > { %v846_v44 = vpop.f32.mrf.mxu0  ;;  %v848_v45 = vpop.f32.mrf.mxu1  ;;  %318 = sbr.rel (%p571_p4) target bundleno = 247 (0xf7), region = 40 }
  0xc7   : > { %v850_v46 = vpop.f32.mrf.mxu2  ;;  %v852_v47 = vpop.f32.mrf.mxu3 }
  0xc8   : > { %v326_v48 = vadd.f32 %v830_v36, %v822_v32  ;;  %v680_v49 = vmov 0.0   ;;  %v350_v50 = vmul.f32 %v822_v32, %v822_v32  ;;  %v351_v51 = vmul.f32 %v830_v36, %v830_v36 }
  0xc9   : > { %323 = vst [vmem:[#allocation2] sm:$0x1] %v680_v49  ;;  %v352_v53 = vmul.f32 %v838_v40, %v838_v40  ;;  %v353_v55 = vmul.f32 %v846_v44, %v846_v44  ;;  %v354_v58 = vmul.f32 %v824_v33, %v824_v33  ;;  %v355_v61 = vmul.f32 %v832_v37, %v832_v37 }
  0xca   : > { %324 = vst [vmem:[#allocation3] sm:$0x1] %v680_v49  ;;  %v327_v52 = vadd.f32 %v326_v48, %v838_v40  ;;  %v366_v56 = vadd.f32 %v351_v51, %v350_v50  ;;  %v356_v0 = vmul.f32 %v840_v41, %v840_v41  ;;  %v357_v3 = vmul.f32 %v848_v45, %v848_v45 }
  0xcb   : > { %v358_v6 = vmul.f32 %v826_v34, %v826_v34  ;;  %v359_v9 = vmul.f32 %v834_v38, %v834_v38  ;;  %v360_v12 = vmul.f32 %v842_v42, %v842_v42  ;;  %v361_v15 = vmul.f32 %v850_v46, %v850_v46 }
  0xcc   : > { %v328_v54 = vadd.f32 %v327_v52, %v846_v44  ;;  %v367_v59 = vadd.f32 %v366_v56, %v352_v53  ;;  %v362_v18 = vmul.f32 %v828_v35, %v828_v35  ;;  %v363_v21 = vmul.f32 %v836_v39, %v836_v39 }
  0xcd   : > { %v364_v24 = vmul.f32 %v844_v43, %v844_v43  ;;  %v365_v27 = vmul.f32 %v852_v47, %v852_v47 }
  0xce   : > { %v329_v57 = vadd.f32 %v328_v54, %v824_v33  ;;  %v368_v62 = vadd.f32 %v367_v59, %v353_v55 }
  0xd0   : > { %v330_v60 = vadd.f32 %v329_v57, %v832_v37  ;;  %v369_v1 = vadd.f32 %v368_v62, %v354_v58  ;;  %v325_v54 = vld [vmem:[#allocation2] sm:$0x1] }
  0xd2   : > { %v331_v63 = vadd.f32 %v330_v60, %v840_v41  ;;  %v370_v4 = vadd.f32 %v369_v1, %v355_v61  ;;  %v349_v60 = vld [vmem:[#allocation3] sm:$0x1] }
  0xd4   : > { %v332_v2 = vadd.f32 %v331_v63, %v848_v45  ;;  %v371_v7 = vadd.f32 %v370_v4, %v356_v0 }
  0xd6   : > { %v333_v5 = vadd.f32 %v332_v2, %v826_v34  ;;  %v372_v10 = vadd.f32 %v371_v7, %v357_v3 }
  0xd8   : > { %v334_v8 = vadd.f32 %v333_v5, %v834_v38  ;;  %v373_v13 = vadd.f32 %v372_v10, %v358_v6 }
  0xda   : > { %v335_v11 = vadd.f32 %v334_v8, %v842_v42  ;;  %v374_v16 = vadd.f32 %v373_v13, %v359_v9 }
  0xdc   : > { %v336_v14 = vadd.f32 %v335_v11, %v850_v46  ;;  %v375_v19 = vadd.f32 %v374_v16, %v360_v12 }
  0xde   : > { %v337_v17 = vadd.f32 %v336_v14, %v828_v35  ;;  %v376_v22 = vadd.f32 %v375_v19, %v361_v15 }
  0xe0   : > { %v338_v20 = vadd.f32 %v337_v17, %v836_v39  ;;  %v377_v25 = vadd.f32 %v376_v22, %v362_v18 }
  0xe2   : > { %v339_v23 = vadd.f32 %v338_v20, %v844_v43  ;;  %v378_v28 = vadd.f32 %v377_v25, %v363_v21 }
  0xe4   : > { %v340_v26 = vadd.f32 %v339_v23, %v852_v47  ;;  %v379_v30 = vadd.f32 %v378_v28, %v364_v24 }
  0xe6   : > { %v341_v29 = vrot.slane %v340_v26, 4  ;;  %v380_v48 = vadd.f32 %v379_v30, %v365_v27 }
  0xe8   : > { %v342_v31 = vadd.f32 %v341_v29, %v340_v26  ;;  %v381_v50 = vrot.slane %v380_v48, 4 }
  0xea   : > { %v343_v49 = vrot.slane %v342_v31, 2  ;;  %v382_v52 = vadd.f32 %v381_v50, %v380_v48 }
  0xec   : > { %v344_v51 = vadd.f32 %v343_v49, %v342_v31  ;;  %v383_v55 = vrot.slane %v382_v52, 2 }
  0xee   : > { %v345_v53 = vrot.slane %v344_v51, 1  ;;  %v384_v57 = vadd.f32 %v383_v55, %v382_v52 }
  0xf0   : > { %v346_v56 = vadd.f32 %v345_v53, %v344_v51  ;;  %v385_v59 = vrot.slane %v384_v57, 1 }
  0xf2   : > { %v347_v58 = vadd.f32 %v346_v56, %v325_v54  ;;  %v386_v61 = vadd.f32 %v385_v59, %v384_v57 }
  0xf4   : > { %348 = vst [vmem:[#allocation2] sm:$0x1] %v347_v58  ;;  %v387_v62 = vadd.f32 %v386_v61, %v349_v60 }
  0xf6   : > { %388 = vst [vmem:[#allocation3] sm:$0x1] %v387_v62 }
  0xf7 PF: > { %p389_p5 = scmp.eq.s32.totalorder %s670_s15, 1 }
  0xf8   : > { %v402_v12 = vld [vmem:[%s986_s2] sm:$0x1] (%p389_p5) }
  0xf9   : > { %394 = sbr.rel (!%p389_p5) target bundleno = 287 (0x11f), region = 48  ;;  %v415_v16 = vld [vmem:[%s987_s3] sm:$0x1] (%p389_p5) }
  0xfb   : > { %v395_v63 = vld [vmem:[#allocation2] sm:$0x1] (%p389_p5) }
  0xfc   : > { %v396_v1 = vmul.f32 (%p389_p5), 0.0078125, %v395_v63 }
  0xfd   : > { %v397_v0 = vld [vmem:[#allocation3] sm:$0x1] (%p389_p5) }
  0xfe   : > { %v398_v2 = vmul.f32 0.0078125, %v397_v0  ;;  %v399_v3 = vmul.f32 %v396_v1, %v396_v1 }
 0x100   : > { %v400_v4 = vsub.f32 %v398_v2, %v399_v3 }
 0x102   : > { %v401_v5 = vmax.f32 %v400_v4, 0.0 }
 0x104   : > { %v403_v6 = vadd.f32 1e-05, %v401_v5 }
 0x106   : > { %652 = vrsqrt.f32 %v403_v6  ;;  %vm410_vm0 = vweird.f32 %v403_v6 }
 0x10c   : > { %v653_v7 = vpop.eup %652 }
 0x10d   : > { %v405_v8 = vmul.f32 %v653_v7, %v403_v6  ;;  %vm411_vm1 = vweird.f32 %v653_v7 }
 0x10e   : > { %vm412_vm2 = vmor %vm410_vm0, %vm411_vm1 }
 0x10f   : > { %v406_v9 = vmul.f32 %v653_v7, %v405_v8 }
 0x111   : > { %v407_v10 = vmul.f32 0.5, %v406_v9 }
 0x113   : > { %v408_v11 = vsub.f32 1.5, %v407_v10 }
 0x115   : > { %v409_v13 = vmul.f32 %v653_v7, %v408_v11 }
 0x117   : > { %v413_v14 = vsel %vm412_vm2, %v653_v7, %v409_v13 }
 0x118   : > { %v414_v15 = vmul.f32 %v413_v14, %v402_v12 }
 0x11a   : > { %418 = vst [vmem:[#allocation2] sm:$0x1] %v414_v15  ;;  %v416_v17 = vmul.f32 %v414_v15, %v396_v1 }
 0x11c   : > { %v417_v18 = vsub.f32 %v415_v16, %v416_v17 }
 0x11e   : > { %419 = vst [vmem:[#allocation3] sm:$0x1] %v417_v18 }
 0x11f PF: > { %p573_p6 = scmp.ne.s32.totalorder %s670_s15, 1 }
 0x121   : > { %422 = sbr.rel (%p573_p6) target bundleno = 317 (0x13d), region = 52 }
 0x126   : > { %v654_v19 = vld [vmem:[#allocation2] ss:$0 sm:$0xff]  ;;  %v655_v20 = vld [vmem:[#allocation3] ss:$0 sm:$0xff] }
 0x127   : > { %v427_v21 = vmul.f32 %v654_v19, %v822_v32  ;;  %v428_v22 = vmul.f32 %v654_v19, %v830_v36  ;;  %v429_v23 = vmul.f32 %v654_v19, %v838_v40  ;;  %v430_v24 = vmul.f32 %v654_v19, %v846_v44 }
 0x128   : > { %v431_v25 = vmul.f32 %v654_v19, %v824_v33  ;;  %v432_v26 = vmul.f32 %v654_v19, %v832_v37  ;;  %v433_v27 = vmul.f32 %v654_v19, %v840_v41  ;;  %v434_v28 = vmul.f32 %v654_v19, %v848_v45 }
 0x129   : > { %v447_v29 = vadd.f32 %v655_v20, %v427_v21  ;;  %v448_v30 = vadd.f32 %v655_v20, %v428_v22  ;;  %v449_v31 = vadd.f32 %v655_v20, %v429_v23  ;;  %v450_v48 = vadd.f32 %v655_v20, %v430_v24 }
 0x12a   : > { %v451_v49 = vadd.f32 %v655_v20, %v431_v25  ;;  %v452_v32 = vadd.f32 %v655_v20, %v432_v26  ;;  %v453_v50 = vadd.f32 %v655_v20, %v433_v27  ;;  %v454_v53 = vadd.f32 %v655_v20, %v434_v28 }
 0x12b   : > { %v463_v36 = vmax.f32 %v447_v29, 0.0  ;;  %v464_v51 = vmax.f32 %v448_v30, 0.0  ;;  %v465_v40 = vmax.f32 %v449_v31, 0.0  ;;  %v466_v52 = vmax.f32 %v450_v48, 0.0 }
 0x12c   : > { %v467_v44 = vmax.f32 %v451_v49, 0.0  ;;  %v435_v33 = vmul.f32 %v654_v19, %v826_v34  ;;  %v436_v37 = vmul.f32 %v654_v19, %v834_v38  ;;  %v437_v41 = vmul.f32 %v654_v19, %v842_v42 }
 0x12d   : > { %479 = vst [vmem:[%s988_s4] sm:$0xff] %v463_v36  ;;  %v438_v45 = vmul.f32 %v654_v19, %v850_v46  ;;  %v468_v54 = vmax.f32 %v452_v32, 0.0  ;;  %v469_v55 = vmax.f32 %v453_v50, 0.0  ;;  %v439_v56 = vmul.f32 %v654_v19, %v828_v35 }
 0x12e   : > { %480 = vst [vmem:[%s988_s4 + $0x8] sm:$0xff] %v464_v51  ;;  %v440_v57 = vmul.f32 %v654_v19, %v836_v39  ;;  %v455_v34 = vadd.f32 %v655_v20, %v435_v33  ;;  %v456_v38 = vadd.f32 %v655_v20, %v436_v37  ;;  %v457_v58 = vadd.f32 %v655_v20, %v437_v41 }
 0x12f   : > { %481 = vst [vmem:[%s988_s4 + $0x10] sm:$0xff] %v465_v40  ;;  %v441_v42 = vmul.f32 %v654_v19, %v844_v43  ;;  %v470_v46 = vmax.f32 %v454_v53, 0.0  ;;  %v458_v59 = vadd.f32 %v655_v20, %v438_v45  ;;  %v442_v60 = vmul.f32 %v654_v19, %v852_v47 }
 0x130   : > { %482 = vst [vmem:[%s988_s4 + $0x18] sm:$0xff] %v466_v52  ;;  %v471_v35 = vmax.f32 %v455_v34, 0.0  ;;  %v459_v39 = vadd.f32 %v655_v20, %v439_v56  ;;  %v472_v61 = vmax.f32 %v456_v38, 0.0  ;;  %v460_v43 = vadd.f32 %v655_v20, %v440_v57 }
 0x131   : > { %483 = vst [vmem:[%s988_s4 + $0x20] sm:$0xff] %v467_v44  ;;  %v473_v62 = vmax.f32 %v457_v58, 0.0  ;;  %v461_v63 = vadd.f32 %v655_v20, %v441_v42  ;;  %v474_v47 = vmax.f32 %v458_v59, 0.0  ;;  %v462_v0 = vadd.f32 %v655_v20, %v442_v60 }
 0x132   : > { %484 = vst [vmem:[%s988_s4 + $0x28] sm:$0xff] %v468_v54  ;;  %v475_v1 = vmax.f32 %v459_v39, 0.0  ;;  %v476_v2 = vmax.f32 %v460_v43, 0.0 }
 0x133   : > { %485 = vst [vmem:[%s988_s4 + $0x30] sm:$0xff] %v469_v55  ;;  %v477_v3 = vmax.f32 %v461_v63, 0.0  ;;  %v478_v4 = vmax.f32 %v462_v0, 0.0 }
 0x134   : > { %486 = vst [vmem:[%s988_s4 + $0x38] sm:$0xff] %v470_v46 }
 0x135   : > { %487 = vst [vmem:[%s988_s4 + $0x40] sm:$0xff] %v471_v35 }
 0x136   : > { %488 = vst [vmem:[%s988_s4 + $0x48] sm:$0xff] %v472_v61 }
 0x137   : > { %489 = vst [vmem:[%s988_s4 + $0x50] sm:$0xff] %v473_v62 }
 0x138   : > { %490 = vst [vmem:[%s988_s4 + $0x58] sm:$0xff] %v474_v47 }
 0x139   : > { %491 = vst [vmem:[%s988_s4 + $0x60] sm:$0xff] %v475_v1 }
 0x13a   : > { %492 = vst [vmem:[%s988_s4 + $0x68] sm:$0xff] %v476_v2 }
 0x13b   : > { %493 = vst [vmem:[%s988_s4 + $0x70] sm:$0xff] %v477_v3 }
 0x13c   : > { %494 = vst [vmem:[%s988_s4 + $0x78] sm:$0xff] %v478_v4 }
 0x13d PF: > { %s14_s17 = sadd.s32 1, %s678_s17   ;;  %s989_s15 = smov %s674_s16 }
 0x13e   : > { %p11_p7 = scmp.ge.s32.totalorder %s14_s17, 4   ;;  %s990_s16 = smov %s992_s18 }
 0x140   :  { %13 = sbr.rel (!%p11_p7) target bundleno = 2 (0x2), region = 82 }

// kernel: encoder_forward.3
= control target key start
LH: loop header
LB: loop body
LE: loop exit
PB: predicated region body
PF: predicated region fallthrough
CT: control target
= control target key end

     0   :  { %s952_s21 = smov 0   ;;  %s954_s22 = smov 0   ;;  %s1379_s0 = inlined_call_operand.vmem [shape: f32[112,256], index: 0, kind: input, shape index: {}]   ;;  %s1380_s1 = inlined_call_operand.vmem [shape: f32[256,128], index: 1, kind: input, shape index: {}]   ;;  %s1381_s2 = inlined_call_operand.vmem [shape: f32[1,128], index: 2, kind: input, shape index: {}]   ;;  %s1382_s3 = inlined_call_operand.vmem [shape: f32[1,128], index: 3, kind: input, shape index: {}]   ;;  %s1383_s4 = inlined_call_operand.vmem [shape: f32[128,128], index: 4, kind: input, shape index: {}]   ;;  %s1384_s5 = inlined_call_operand.vmem [shape: f32[1,128], index: 5, kind: input, shape index: {}]   ;;  %s1385_s6 = inlined_call_operand.vmem [shape: f32[112,128], index: 6, kind: output, shape index: {}]  }
   0x1   :  { %s956_s23 = smov 0  }
   0x2 LB: > { %s28_s24 = sadd.s32 1, %s910_s22  ;;  %p773_p0 = scmp.ge.s32.totalorder %s914_s23, 1  ;;  %s914_s23 = sphi %s956_s23, %s16_s23   ;;  %s910_s22 = sphi %s954_s22, %s1387_s22   ;;  %s906_s21 = sphi %s952_s21, %s1386_s21  }
   0x3   : > { %p30_p1 = scmp.ge.s32.totalorder %s28_s24, 2  ;;  %p228_p2 = scmp.lt.s32.totalorder %s914_s23, 3 }
   0x5   : > { %s1389_s24 = smov (%p30_p1, %s28_s24), 0  ;;  %p229_p3 = pnand %p773_p0, %p228_p2 }
   0x6   : > { %p774_p4 = scmp.ne.s32.totalorder (!%p229_p3), %s906_s21, 0 }
   0x7   : > { %232 = sbr.rel (%p229_p3) target bundleno = 508 (0x1fc), region = 44 }
   0xc   : > { %v318_v0 = vld [vmem:[%s1380_s1 + $0x78] sm:$0xff]  ;;  %v317_v2 = vld [vmem:[%s1380_s1 + $0x70] sm:$0xff]  ;;  %v316_v4 = vld [vmem:[%s1380_s1 + $0x68] sm:$0xff] }
   0xd   : > { %v334_v1 = vld [vmem:[%s1380_s1 + $0xf8] sm:$0xff]  ;;  %782 = vmatpush.msra.mxu2 %v318_v0  ;;  %v333_v3 = vld [vmem:[%s1380_s1 + $0xf0] sm:$0xff]  ;;  %v332_v5 = vld [vmem:[%s1380_s1 + $0xe8] sm:$0xff]  ;;  %335 = vmatpush.msra.mxu0 %v318_v0 }
   0xe   : > { %798 = vmatpush.msra.mxu3 %v334_v1  ;;  %394 = vmatpush.msra.mxu1 %v334_v1  ;;  %v315_v6 = vld [vmem:[%s1380_s1 + $0x60] sm:$0xff]  ;;  %v314_v8 = vld [vmem:[%s1380_s1 + $0x58] sm:$0xff]  ;;  %v313_v10 = vld [vmem:[%s1380_s1 + $0x50] sm:$0xff] }
   0xf   : > { %783 = vmatpush.msra.mxu2 %v317_v2  ;;  %v331_v7 = vld [vmem:[%s1380_s1 + $0xe0] sm:$0xff]  ;;  %336 = vmatpush.msra.mxu0 %v317_v2  ;;  %v330_v9 = vld [vmem:[%s1380_s1 + $0xd8] sm:$0xff]  ;;  %v329_v11 = vld [vmem:[%s1380_s1 + $0xd0] sm:$0xff] }
  0x10   : > { %799 = vmatpush.msra.mxu3 %v333_v3  ;;  %395 = vmatpush.msra.mxu1 %v333_v3  ;;  %v312_v12 = vld [vmem:[%s1380_s1 + $0x48] sm:$0xff]  ;;  %v311_v14 = vld [vmem:[%s1380_s1 + $0x40] sm:$0xff]  ;;  %v310_v16 = vld [vmem:[%s1380_s1 + $0x38] sm:$0xff] }
  0x11   : > { %784 = vmatpush.msra.mxu2 %v316_v4  ;;  %337 = vmatpush.msra.mxu0 %v316_v4  ;;  %v328_v13 = vld [vmem:[%s1380_s1 + $0xc8] sm:$0xff]  ;;  %v327_v15 = vld [vmem:[%s1380_s1 + $0xc0] sm:$0xff]  ;;  %v326_v17 = vld [vmem:[%s1380_s1 + $0xb8] sm:$0xff] }
  0x12   : > { %800 = vmatpush.msra.mxu3 %v332_v5  ;;  %396 = vmatpush.msra.mxu1 %v332_v5  ;;  %v309_v18 = vld [vmem:[%s1380_s1 + $0x30] sm:$0xff]  ;;  %v308_v20 = vld [vmem:[%s1380_s1 + $0x28] sm:$0xff]  ;;  %v307_v22 = vld [vmem:[%s1380_s1 + $0x20] sm:$0xff] }
  0x13   : > { %785 = vmatpush.msra.mxu2 %v315_v6  ;;  %338 = vmatpush.msra.mxu0 %v315_v6  ;;  %v325_v19 = vld [vmem:[%s1380_s1 + $0xb0] sm:$0xff]  ;;  %v324_v21 = vld [vmem:[%s1380_s1 + $0xa8] sm:$0xff]  ;;  %v323_v23 = vld [vmem:[%s1380_s1 + $0xa0] sm:$0xff] }
  0x14   : > { %801 = vmatpush.msra.mxu3 %v331_v7  ;;  %397 = vmatpush.msra.mxu1 %v331_v7  ;;  %v306_v24 = vld [vmem:[%s1380_s1 + $0x18] sm:$0xff]  ;;  %v305_v26 = vld [vmem:[%s1380_s1 + $0x10] sm:$0xff]  ;;  %v304_v28 = vld [vmem:[%s1380_s1 + $0x8] sm:$0xff] }
  0x15   : > { %786 = vmatpush.msra.mxu2 %v314_v8  ;;  %339 = vmatpush.msra.mxu0 %v314_v8  ;;  %v322_v25 = vld [vmem:[%s1380_s1 + $0x98] sm:$0xff]  ;;  %v321_v27 = vld [vmem:[%s1380_s1 + $0x90] sm:$0xff]  ;;  %v320_v29 = vld [vmem:[%s1380_s1 + $0x88] sm:$0xff] }
  0x16   : > { %802 = vmatpush.msra.mxu3 %v330_v9  ;;  %398 = vmatpush.msra.mxu1 %v330_v9  ;;  %v303_v30 = vld [vmem:[%s1380_s1] sm:$0xff]  ;;  %v289_v32 = vld [vmem:[%s1379_s0 + $0x70] sm:$0xff]  ;;  %v290_v33 = vld [vmem:[%s1379_s0 + $0x78] sm:$0xff] }
  0x17   : > { %787 = vmatpush.msra.mxu2 %v313_v10  ;;  %340 = vmatpush.msra.mxu0 %v313_v10  ;;  %v319_v31 = vld [vmem:[%s1380_s1 + $0x80] sm:$0xff]  ;;  %v276_v35 = vld [vmem:[%s1379_s0 + $0x8] sm:$0xff]  ;;  %v277_v38 = vld [vmem:[%s1379_s0 + $0x10] sm:$0xff] }
  0x18   : > { %803 = vmatpush.msra.mxu3 %v329_v11  ;;  %399 = vmatpush.msra.mxu1 %v329_v11  ;;  %v275_v34 = vld [vmem:[%s1379_s0] sm:$0xff]  ;;  %v292_v37 = vld [vmem:[%s1379_s0 + $0x88] sm:$0xff]  ;;  %v278_v39 = vld [vmem:[%s1379_s0 + $0x18] sm:$0xff] }
  0x19   : > { %788 = vmatpush.msra.mxu2 %v312_v12  ;;  %341 = vmatpush.msra.mxu0 %v312_v12  ;;  %v291_v36 = vld [vmem:[%s1379_s0 + $0x80] sm:$0xff]  ;;  %v293_v40 = vld [vmem:[%s1379_s0 + $0x90] sm:$0xff]  ;;  %v294_v41 = vld [vmem:[%s1379_s0 + $0x98] sm:$0xff] }
  0x1a   : > { %804 = vmatpush.msra.mxu3 %v328_v13  ;;  %400 = vmatpush.msra.mxu1 %v328_v13  ;;  %v279_v42 = vld [vmem:[%s1379_s0 + $0x20] sm:$0xff]  ;;  %v280_v43 = vld [vmem:[%s1379_s0 + $0x28] sm:$0xff]  ;;  %v281_v46 = vld [vmem:[%s1379_s0 + $0x30] sm:$0xff] }
  0x1b   : > { %789 = vmatpush.msra.mxu2 %v311_v14  ;;  %342 = vmatpush.msra.mxu0 %v311_v14  ;;  %v295_v44 = vld [vmem:[%s1379_s0 + $0xa0] sm:$0xff]  ;;  %v296_v45 = vld [vmem:[%s1379_s0 + $0xa8] sm:$0xff]  ;;  %v282_v47 = vld [vmem:[%s1379_s0 + $0x38] sm:$0xff] }
  0x1c   : > { %805 = vmatpush.msra.mxu3 %v327_v15  ;;  %401 = vmatpush.msra.mxu1 %v327_v15  ;;  %v297_v48 = vld [vmem:[%s1379_s0 + $0xb0] sm:$0xff]  ;;  %v298_v49 = vld [vmem:[%s1379_s0 + $0xb8] sm:$0xff]  ;;  %v283_v50 = vld [vmem:[%s1379_s0 + $0x40] sm:$0xff] }
  0x1d   : > { %790 = vmatpush.msra.mxu2 %v310_v16  ;;  %343 = vmatpush.msra.mxu0 %v310_v16  ;;  %v284_v51 = vld [vmem:[%s1379_s0 + $0x48] sm:$0xff]  ;;  %v299_v52 = vld [vmem:[%s1379_s0 + $0xc0] sm:$0xff]  ;;  %v285_v54 = vld [vmem:[%s1379_s0 + $0x50] sm:$0xff] }
  0x1e   : > { %806 = vmatpush.msra.mxu3 %v326_v17  ;;  %402 = vmatpush.msra.mxu1 %v326_v17  ;;  %v300_v53 = vld [vmem:[%s1379_s0 + $0xc8] sm:$0xff]  ;;  %v286_v55 = vld [vmem:[%s1379_s0 + $0x58] sm:$0xff]  ;;  %v301_v56 = vld [vmem:[%s1379_s0 + $0xd0] sm:$0xff] }
  0x1f   : > { %791 = vmatpush.msra.mxu2 %v309_v18  ;;  %344 = vmatpush.msra.mxu0 %v309_v18  ;;  %v302_v57 = vld [vmem:[%s1379_s0 + $0xd8] sm:$0xff]  ;;  %v287_v58 = vld [vmem:[%s1379_s0 + $0x60] sm:$0xff]  ;;  %v288_v59 = vld [vmem:[%s1379_s0 + $0x68] sm:$0xff] }
  0x20   : > { %807 = vmatpush.msra.mxu3 %v325_v19  ;;  %403 = vmatpush.msra.mxu1 %v325_v19 }
  0x21   : > { %792 = vmatpush.msra.mxu2 %v308_v20  ;;  %345 = vmatpush.msra.mxu0 %v308_v20 }
  0x22   : > { %808 = vmatpush.msra.mxu3 %v324_v21  ;;  %404 = vmatpush.msra.mxu1 %v324_v21 }
  0x23   : > { %793 = vmatpush.msra.mxu2 %v307_v22  ;;  %346 = vmatpush.msra.mxu0 %v307_v22 }
  0x24   : > { %809 = vmatpush.msra.mxu3 %v323_v23  ;;  %405 = vmatpush.msra.mxu1 %v323_v23 }
  0x25   : > { %794 = vmatpush.msra.mxu2 %v306_v24  ;;  %347 = vmatpush.msra.mxu0 %v306_v24 }
  0x26   : > { %810 = vmatpush.msra.mxu3 %v322_v25  ;;  %406 = vmatpush.msra.mxu1 %v322_v25 }
  0x27   : > { %795 = vmatpush.msra.mxu2 %v305_v26  ;;  %348 = vmatpush.msra.mxu0 %v305_v26 }
  0x28   : > { %811 = vmatpush.msra.mxu3 %v321_v27  ;;  %407 = vmatpush.msra.mxu1 %v321_v27 }
  0x29   : > { %796 = vmatpush.msra.mxu2 %v304_v28  ;;  %349 = vmatpush.msra.mxu0 %v304_v28 }
  0x2a   : > { %812 = vmatpush.msra.mxu3 %v320_v29  ;;  %408 = vmatpush.msra.mxu1 %v320_v29 }
  0x2b   : > { %797 = vmatpush.msra.mxu2 %v303_v30  ;;  %350 = vmatpush.msra.mxu0 %v303_v30 }
  0x2c   : > { %813 = vmatpush.msra.mxu3 %v319_v31  ;;  %372 = vmatmul.f32.vlgmr.msra.gmra.mxu2 %v289_v32 }
  0x2d   : > { %431 = vmatmul.f32.vlgmr.msra.gmra.mxu3 %v290_v33  ;;  %409 = vmatpush.msra.mxu1 %v319_v31 }
  0x2e   : > { %351 = vmatmul.f32.vlgmr.msra.gmra.mxu0 %v275_v34  ;;  %410 = vmatmul.f32.vlgmr.msra.gmra.mxu1 %v276_v35 }
  0x34   : > { %375 = vmatmul.f32.gmra.mxu2 %v291_v36 }
  0x35   : > { %434 = vmatmul.f32.gmra.mxu3 %v292_v37 }
  0x36   : > { %354 = vmatmul.f32.gmra.mxu0 %v277_v38  ;;  %413 = vmatmul.f32.gmra.mxu1 %v278_v39 }
  0x3c   : > { %378 = vmatmul.f32.gmra.mxu2 %v293_v40 }
  0x3d   : > { %437 = vmatmul.f32.gmra.mxu3 %v294_v41 }
  0x3e   : > { %357 = vmatmul.f32.gmra.mxu0 %v279_v42  ;;  %416 = vmatmul.f32.gmra.mxu1 %v280_v43 }
  0x44   : > { %381 = vmatmul.f32.gmra.mxu2 %v295_v44 }
  0x45   : > { %440 = vmatmul.f32.gmra.mxu3 %v296_v45 }
  0x46   : > { %360 = vmatmul.f32.gmra.mxu0 %v281_v46  ;;  %419 = vmatmul.f32.gmra.mxu1 %v282_v47 }
  0x4c   : > { %384 = vmatmul.f32.gmra.mxu2 %v297_v48 }
  0x4d   : > { %443 = vmatmul.f32.gmra.mxu3 %v298_v49 }
  0x4e   : > { %363 = vmatmul.f32.gmra.mxu0 %v283_v50  ;;  %422 = vmatmul.f32.gmra.mxu1 %v284_v51 }
  0x54   : > { %387 = vmatmul.f32.gmra.mxu2 %v299_v52 }
  0x55   : > { %446 = vmatmul.f32.gmra.mxu3 %v300_v53 }
  0x56   : > { %366 = vmatmul.f32.gmra.mxu0 %v285_v54  ;;  %425 = vmatmul.f32.gmra.mxu1 %v286_v55 }
  0x5c   : > { %390 = vmatmul.f32.gmra.mxu2 %v301_v56 }
  0x5d   : > { %449 = vmatmul.f32.gmra.mxu3 %v302_v57 }
  0x5e   : > { %369 = vmatmul.f32.gmra.mxu0 %v287_v58  ;;  %428 = vmatmul.f32.gmra.mxu1 %v288_v59 }
  0xab   : > { %v352_v60 = vpop.f32.mrf.mxu0  ;;  %v411_v61 = vpop.f32.mrf.mxu1 }
  0xac   : > { %v1152_v62 = vadd.f32 %v411_v61, %v352_v60 }
  0xaf   : > { %v373_v63 = vpop.f32.mrf.mxu2 }
  0xb0   : > { %v432_v0 = vpop.f32.mrf.mxu3 }
  0xb1   : > { %v1154_v1 = vadd.f32 %v432_v0, %v373_v63 }
  0xb3   : > { %v355_v2 = vpop.f32.mrf.mxu0  ;;  %v414_v3 = vpop.f32.mrf.mxu1 }
  0xb4   : > { %v1156_v4 = vadd.f32 %v414_v3, %v355_v2 }
  0xb7   : > { %v376_v5 = vpop.f32.mrf.mxu2 }
  0xb8   : > { %v435_v6 = vpop.f32.mrf.mxu3 }
  0xb9   : > { %v1158_v7 = vadd.f32 %v435_v6, %v376_v5 }
  0xbb   : > { %v358_v8 = vpop.f32.mrf.mxu0  ;;  %v417_v9 = vpop.f32.mrf.mxu1 }
  0xbc   : > { %v1160_v10 = vadd.f32 %v417_v9, %v358_v8 }
  0xbf   : > { %v379_v11 = vpop.f32.mrf.mxu2 }
  0xc0   : > { %v438_v12 = vpop.f32.mrf.mxu3 }
  0xc1   : > { %v1162_v13 = vadd.f32 %v438_v12, %v379_v11 }
  0xc3   : > { %v361_v14 = vpop.f32.mrf.mxu0  ;;  %v420_v15 = vpop.f32.mrf.mxu1 }
  0xc4   : > { %v1164_v16 = vadd.f32 %v420_v15, %v361_v14 }
  0xc7   : > { %v382_v17 = vpop.f32.mrf.mxu2 }
  0xc8   : > { %v441_v18 = vpop.f32.mrf.mxu3 }
  0xc9   : > { %v1166_v19 = vadd.f32 %v441_v18, %v382_v17 }
  0xcb   : > { %v364_v20 = vpop.f32.mrf.mxu0  ;;  %v423_v21 = vpop.f32.mrf.mxu1 }
  0xcc   : > { %v1168_v22 = vadd.f32 %v423_v21, %v364_v20 }
  0xcf   : > { %v385_v23 = vpop.f32.mrf.mxu2 }
  0xd0   : > { %v444_v24 = vpop.f32.mrf.mxu3 }
  0xd1   : > { %v1170_v25 = vadd.f32 %v444_v24, %v385_v23 }
  0xd3   : > { %v367_v26 = vpop.f32.mrf.mxu0  ;;  %v426_v27 = vpop.f32.mrf.mxu1 }
  0xd4   : > { %v1172_v28 = vadd.f32 %v426_v27, %v367_v26 }
  0xd7   : > { %v388_v29 = vpop.f32.mrf.mxu2 }
  0xd8   : > { %v447_v30 = vpop.f32.mrf.mxu3 }
  0xd9   : > { %v1174_v31 = vadd.f32 %v447_v30, %v388_v29 }
  0xdb   : > { %v370_v32 = vpop.f32.mrf.mxu0  ;;  %v429_v33 = vpop.f32.mrf.mxu1 }
  0xdc   : > { %v1176_v34 = vadd.f32 %v429_v33, %v370_v32 }
  0xdd   : > { %456 = sbr.rel (%p774_p4) target bundleno = 269 (0x10d), region = 48 }
  0xdf   : > { %v391_v35 = vpop.f32.mrf.mxu2 }
  0xe0   : > { %v450_v36 = vpop.f32.mrf.mxu3 }
  0xe1   : > { %v1178_v37 = vadd.f32 %v450_v36, %v391_v35 }
  0xe2   : > { %v464_v38 = vadd.f32 %v1156_v4, %v1152_v62  ;;  %v486_v39 = vmul.f32 %v1152_v62, %v1152_v62  ;;  %v487_v40 = vmul.f32 %v1156_v4, %v1156_v4  ;;  %v916_v41 = vmov 0.0  }
  0xe3   : > { %461 = vst [vmem:[#allocation2] sm:$0x1] %v916_v41  ;;  %v488_v43 = vmul.f32 %v1160_v10, %v1160_v10  ;;  %v489_v45 = vmul.f32 %v1164_v16, %v1164_v16  ;;  %v490_v48 = vmul.f32 %v1168_v22, %v1168_v22  ;;  %v491_v51 = vmul.f32 %v1172_v28, %v1172_v28 }
  0xe4   : > { %462 = vst [vmem:[#allocation3] sm:$0x1] %v916_v41  ;;  %v465_v42 = vadd.f32 %v464_v38, %v1160_v10  ;;  %v500_v46 = vadd.f32 %v487_v40, %v486_v39  ;;  %v492_v54 = vmul.f32 %v1176_v34, %v1176_v34  ;;  %v493_v57 = vmul.f32 %v1154_v1, %v1154_v1 }
  0xe5   : > { %v494_v60 = vmul.f32 %v1158_v7, %v1158_v7  ;;  %v495_v0 = vmul.f32 %v1162_v13, %v1162_v13  ;;  %v496_v5 = vmul.f32 %v1166_v19, %v1166_v19  ;;  %v497_v9 = vmul.f32 %v1170_v25, %v1170_v25 }
  0xe6   : > { %v466_v44 = vadd.f32 %v465_v42, %v1164_v16  ;;  %v501_v49 = vadd.f32 %v500_v46, %v488_v43  ;;  %v498_v14 = vmul.f32 %v1174_v31, %v1174_v31  ;;  %v499_v18 = vmul.f32 %v1178_v37, %v1178_v37 }
  0xe8   : > { %v467_v47 = vadd.f32 %v466_v44, %v1168_v22  ;;  %v502_v52 = vadd.f32 %v501_v49, %v489_v45 }
  0xea   : > { %v468_v50 = vadd.f32 %v467_v47, %v1172_v28  ;;  %v503_v55 = vadd.f32 %v502_v52, %v490_v48  ;;  %v463_v36 = vld [vmem:[#allocation2] sm:$0x1] }
  0xeb   : > { %v485_v42 = vld [vmem:[#allocation3] sm:$0x1] }
  0xec   : > { %v469_v53 = vadd.f32 %v468_v50, %v1176_v34  ;;  %v504_v58 = vadd.f32 %v503_v55, %v491_v51 }
  0xee   : > { %v470_v56 = vadd.f32 %v469_v53, %v1154_v1  ;;  %v505_v61 = vadd.f32 %v504_v58, %v492_v54 }
  0xf0   : > { %v471_v59 = vadd.f32 %v470_v56, %v1158_v7  ;;  %v506_v2 = vadd.f32 %v505_v61, %v493_v57 }
  0xf2   : > { %v472_v63 = vadd.f32 %v471_v59, %v1162_v13  ;;  %v507_v6 = vadd.f32 %v506_v2, %v494_v60 }
  0xf4   : > { %v473_v3 = vadd.f32 %v472_v63, %v1166_v19  ;;  %v508_v11 = vadd.f32 %v507_v6, %v495_v0 }
  0xf6   : > { %v474_v8 = vadd.f32 %v473_v3, %v1170_v25  ;;  %v509_v15 = vadd.f32 %v508_v11, %v496_v5 }
  0xf8   : > { %v475_v12 = vadd.f32 %v474_v8, %v1174_v31  ;;  %v510_v20 = vadd.f32 %v509_v15, %v497_v9 }
  0xfa   : > { %v476_v17 = vadd.f32 %v475_v12, %v1178_v37  ;;  %v511_v23 = vadd.f32 %v510_v20, %v498_v14 }
  0xfc   : > { %v477_v21 = vrot.slane %v476_v17, 4  ;;  %v512_v26 = vadd.f32 %v511_v23, %v499_v18 }
  0xfe   : > { %v478_v24 = vadd.f32 %v477_v21, %v476_v17  ;;  %v513_v29 = vrot.slane %v512_v26, 4 }
 0x100   : > { %v479_v27 = vrot.slane %v478_v24, 2  ;;  %v514_v32 = vadd.f32 %v513_v29, %v512_v26 }
 0x102   : > { %v480_v30 = vadd.f32 %v479_v27, %v478_v24  ;;  %v515_v35 = vrot.slane %v514_v32, 2 }
 0x104   : > { %v481_v33 = vrot.slane %v480_v30, 1  ;;  %v516_v39 = vadd.f32 %v515_v35, %v514_v32 }
 0x106   : > { %v482_v38 = vadd.f32 %v481_v33, %v480_v30  ;;  %v517_v41 = vrot.slane %v516_v39, 1 }
 0x108   : > { %v483_v40 = vadd.f32 %v482_v38, %v463_v36  ;;  %v518_v43 = vadd.f32 %v517_v41, %v516_v39 }
 0x10a   : > { %484 = vst [vmem:[#allocation2] sm:$0x1] %v483_v40  ;;  %v519_v44 = vadd.f32 %v518_v43, %v485_v42 }
 0x10c   : > { %520 = vst [vmem:[#allocation3] sm:$0x1] %v519_v44 }
 0x10d PF: > { %p521_p5 = scmp.eq.s32.totalorder %s906_s21, 1 }
 0x10e   : > { %v534_v58 = vld [vmem:[%s1381_s2] sm:$0x1] (%p521_p5) }
 0x10f   : > { %526 = sbr.rel (!%p521_p5) target bundleno = 309 (0x135), region = 56  ;;  %v547_v63 = vld [vmem:[%s1382_s3] sm:$0x1] (%p521_p5) }
 0x111   : > { %v527_v45 = vld [vmem:[#allocation2] sm:$0x1] (%p521_p5) }
 0x112   : > { %v528_v47 = vmul.f32 (%p521_p5), 0.010204081, %v527_v45 }
 0x113   : > { %v529_v46 = vld [vmem:[#allocation3] sm:$0x1] (%p521_p5) }
 0x114   : > { %v530_v48 = vmul.f32 0.010204081, %v529_v46  ;;  %v531_v49 = vmul.f32 %v528_v47, %v528_v47 }
 0x116   : > { %v532_v50 = vsub.f32 %v530_v48, %v531_v49 }
 0x118   : > { %v533_v51 = vmax.f32 %v532_v50, 0.0 }
 0x11a   : > { %v535_v52 = vadd.f32 1e-05, %v533_v51 }
 0x11c   : > { %887 = vrsqrt.f32 %v535_v52  ;;  %vm542_vm0 = vweird.f32 %v535_v52 }
 0x122   : > { %v888_v53 = vpop.eup %887 }
 0x123   : > { %v537_v54 = vmul.f32 %v888_v53, %v535_v52  ;;  %vm543_vm1 = vweird.f32 %v888_v53 }
 0x124   : > { %vm544_vm2 = vmor %vm542_vm0, %vm543_vm1 }
 0x125   : > { %v538_v55 = vmul.f32 %v888_v53, %v537_v54 }
 0x127   : > { %v539_v56 = vmul.f32 0.5, %v538_v55 }
 0x129   : > { %v540_v57 = vsub.f32 1.5, %v539_v56 }
 0x12b   : > { %v541_v59 = vmul.f32 %v888_v53, %v540_v57 }
 0x12d   : > { %v545_v60 = vsel %vm544_vm2, %v888_v53, %v541_v59 }
 0x12e   : > { %v546_v61 = vmul.f32 %v545_v60, %v534_v58 }
 0x130   : > { %550 = vst [vmem:[#allocation2] sm:$0x1] %v546_v61  ;;  %v548_v0 = vmul.f32 %v546_v61, %v528_v47 }
 0x132   : > { %v549_v2 = vsub.f32 %v547_v63, %v548_v0 }
 0x134   : > { %551 = vst [vmem:[#allocation3] sm:$0x1] %v549_v2 }
 0x135 PF: > { %p776_p6 = scmp.ne.s32.totalorder %s906_s21, 1 }
 0x137   : > { %554 = sbr.rel (%p776_p6) target bundleno = 508 (0x1fc), region = 60 }
 0x13c   : > { %v620_v3 = vld [vmem:[%s1383_s4 + $0x78] sm:$0xff]  ;;  %v619_v5 = vld [vmem:[%s1383_s4 + $0x70] sm:$0xff]  ;;  %v618_v6 = vld [vmem:[%s1383_s4 + $0x68] sm:$0xff] }
 0x13d   : > { %815 = vmatpush.msra.mxu2 %v620_v3  ;;  %816 = vmatpush.msra.mxu3 %v620_v3  ;;  %v617_v8 = vld [vmem:[%s1383_s4 + $0x60] sm:$0xff]  ;;  %v616_v9 = vld [vmem:[%s1383_s4 + $0x58] sm:$0xff]  ;;  %v615_v11 = vld [vmem:[%s1383_s4 + $0x50] sm:$0xff] }
 0x13e   : > { %625 = vmatpush.msra.mxu0 %v620_v3  ;;  %814 = vmatpush.msra.mxu1 %v620_v3  ;;  %v614_v12 = vld [vmem:[%s1383_s4 + $0x48] sm:$0xff]  ;;  %v613_v14 = vld [vmem:[%s1383_s4 + $0x40] sm:$0xff]  ;;  %v612_v15 = vld [vmem:[%s1383_s4 + $0x38] sm:$0xff] }
 0x13f   : > { %818 = vmatpush.msra.mxu2 %v619_v5  ;;  %819 = vmatpush.msra.mxu3 %v619_v5  ;;  %v611_v17 = vld [vmem:[%s1383_s4 + $0x30] sm:$0xff]  ;;  %v1261_v18 = vld [vmem:[#allocation2] ss:$0 sm:$0xff]  ;;  %v610_v20 = vld [vmem:[%s1383_s4 + $0x28] sm:$0xff] }
 0x140   : > { %626 = vmatpush.msra.mxu0 %v619_v5  ;;  %817 = vmatpush.msra.mxu1 %v619_v5  ;;  %v609_v21 = vld [vmem:[%s1383_s4 + $0x20] sm:$0xff]  ;;  %v565_v23 = vmul.f32 %v1261_v18, %v1176_v34  ;;  %v569_v26 = vmul.f32 %v1261_v18, %v1166_v19  ;;  %v608_v27 = vld [vmem:[%s1383_s4 + $0x18] sm:$0xff]  ;;  %v559_v29 = vmul.f32 %v1261_v18, %v1152_v62  ;;  %v607_v19 = vld [vmem:[%s1383_s4 + $0x10] sm:$0xff] }
 0x141   : > { %821 = vmatpush.msra.mxu2 %v618_v6  ;;  %822 = vmatpush.msra.mxu3 %v618_v6  ;;  %v1271_v24 = vld [vmem:[#allocation3] ss:$0 sm:$0xff]  ;;  %v562_v34 = vmul.f32 %v1261_v18, %v1164_v16  ;;  %v606_v62 = vld [vmem:[%s1383_s4 + $0x8] sm:$0xff]  ;;  %v566_v39 = vmul.f32 %v1261_v18, %v1154_v1  ;;  %v570_v40 = vmul.f32 %v1261_v18, %v1170_v25 }
 0x142   : > { %627 = vmatpush.msra.mxu0 %v618_v6  ;;  %820 = vmatpush.msra.mxu1 %v618_v6  ;;  %v583_v30 = vadd.f32 %v1271_v24, %v565_v23  ;;  %v587_v32 = vadd.f32 %v1271_v24, %v569_v26  ;;  %v577_v16 = vadd.f32 %v1271_v24, %v559_v29  ;;  %v605_v35 = vld [vmem:[%s1383_s4] sm:$0xff] }
 0x143   : > { %824 = vmatpush.msra.mxu2 %v617_v8  ;;  %825 = vmatpush.msra.mxu3 %v617_v8  ;;  %v580_v33 = vadd.f32 %v1271_v24, %v562_v34  ;;  %v560_v43 = vmul.f32 %v1261_v18, %v1156_v4  ;;  %v563_v44 = vmul.f32 %v1261_v18, %v1168_v22 }
 0x144   : > { %628 = vmatpush.msra.mxu0 %v617_v8  ;;  %823 = vmatpush.msra.mxu1 %v617_v8  ;;  %v597_v36 = vmax.f32 %v583_v30, 0.0  ;;  %v601_v38 = vmax.f32 %v587_v32, 0.0  ;;  %v591_v41 = vmax.f32 %v577_v16, 0.0  ;;  %v584_v1 = vadd.f32 %v1271_v24, %v566_v39 }
 0x145   : > { %827 = vmatpush.msra.mxu2 %v616_v9  ;;  %828 = vmatpush.msra.mxu3 %v616_v9  ;;  %v594_v42 = vmax.f32 %v580_v33, 0.0  ;;  %v588_v25 = vadd.f32 %v1271_v24, %v570_v40  ;;  %v578_v45 = vadd.f32 %v1271_v24, %v560_v43  ;;  %v581_v46 = vadd.f32 %v1271_v24, %v563_v44 }
 0x146   : > { %629 = vmatpush.msra.mxu0 %v616_v9  ;;  %826 = vmatpush.msra.mxu1 %v616_v9  ;;  %v598_v4 = vmax.f32 %v584_v1, 0.0  ;;  %v567_v22 = vmul.f32 %v1261_v18, %v1158_v7  ;;  %v571_v48 = vmul.f32 %v1261_v18, %v1174_v31  ;;  %v561_v51 = vmul.f32 %v1261_v18, %v1160_v10 }
 0x147   : > { %830 = vmatpush.msra.mxu2 %v615_v11  ;;  %831 = vmatpush.msra.mxu3 %v615_v11  ;;  %v602_v47 = vmax.f32 %v588_v25, 0.0  ;;  %v592_v49 = vmax.f32 %v578_v45, 0.0  ;;  %v595_v50 = vmax.f32 %v581_v46, 0.0  ;;  %v564_v52 = vmul.f32 %v1261_v18, %v1172_v28 }
 0x148   : > { %630 = vmatpush.msra.mxu0 %v615_v11  ;;  %829 = vmatpush.msra.mxu1 %v615_v11  ;;  %v585_v53 = vadd.f32 %v1271_v24, %v567_v22  ;;  %v589_v54 = vadd.f32 %v1271_v24, %v571_v48  ;;  %v579_v7 = vadd.f32 %v1271_v24, %v561_v51 }
 0x149   : > { %833 = vmatpush.msra.mxu2 %v614_v12  ;;  %834 = vmatpush.msra.mxu3 %v614_v12  ;;  %v582_v31 = vadd.f32 %v1271_v24, %v564_v52  ;;  %v568_v10 = vmul.f32 %v1261_v18, %v1162_v13  ;;  %v572_v28 = vmul.f32 %v1261_v18, %v1178_v37  ;;  %v891_v13 = vld [vmem:[%s1384_s5] ss:$0 sm:$0xff] }
 0x14a   : > { %631 = vmatpush.msra.mxu0 %v614_v12  ;;  %832 = vmatpush.msra.mxu1 %v614_v12  ;;  %v599_v55 = vmax.f32 %v585_v53, 0.0  ;;  %v603_v56 = vmax.f32 %v589_v54, 0.0  ;;  %v593_v57 = vmax.f32 %v579_v7, 0.0 }
 0x14b   : > { %836 = vmatpush.msra.mxu2 %v613_v14  ;;  %837 = vmatpush.msra.mxu3 %v613_v14  ;;  %v596_v58 = vmax.f32 %v582_v31, 0.0  ;;  %v586_v59 = vadd.f32 %v1271_v24, %v568_v10  ;;  %v590_v60 = vadd.f32 %v1271_v24, %v572_v28 }
 0x14c   : > { %632 = vmatpush.msra.mxu0 %v613_v14  ;;  %835 = vmatpush.msra.mxu1 %v613_v14 }
 0x14d   : > { %839 = vmatpush.msra.mxu2 %v612_v15  ;;  %840 = vmatpush.msra.mxu3 %v612_v15  ;;  %v600_v61 = vmax.f32 %v586_v59, 0.0  ;;  %v604_v63 = vmax.f32 %v590_v60, 0.0 }
 0x14e   : > { %633 = vmatpush.msra.mxu0 %v612_v15  ;;  %838 = vmatpush.msra.mxu1 %v612_v15 }
 0x14f   : > { %842 = vmatpush.msra.mxu2 %v611_v17  ;;  %843 = vmatpush.msra.mxu3 %v611_v17 }
 0x150   : > { %634 = vmatpush.msra.mxu0 %v611_v17  ;;  %841 = vmatpush.msra.mxu1 %v611_v17 }
 0x151   : > { %845 = vmatpush.msra.mxu2 %v610_v20  ;;  %846 = vmatpush.msra.mxu3 %v610_v20 }
 0x152   : > { %635 = vmatpush.msra.mxu0 %v610_v20  ;;  %844 = vmatpush.msra.mxu1 %v610_v20 }
 0x153   : > { %848 = vmatpush.msra.mxu2 %v609_v21  ;;  %849 = vmatpush.msra.mxu3 %v609_v21 }
 0x154   : > { %636 = vmatpush.msra.mxu0 %v609_v21  ;;  %847 = vmatpush.msra.mxu1 %v609_v21 }
 0x155   : > { %851 = vmatpush.msra.mxu2 %v608_v27  ;;  %852 = vmatpush.msra.mxu3 %v608_v27 }
 0x156   : > { %637 = vmatpush.msra.mxu0 %v608_v27  ;;  %850 = vmatpush.msra.mxu1 %v608_v27 }
 0x157   : > { %854 = vmatpush.msra.mxu2 %v607_v19  ;;  %855 = vmatpush.msra.mxu3 %v607_v19 }
 0x158   : > { %638 = vmatpush.msra.mxu0 %v607_v19  ;;  %853 = vmatpush.msra.mxu1 %v607_v19 }
 0x159   : > { %857 = vmatpush.msra.mxu2 %v606_v62  ;;  %858 = vmatpush.msra.mxu3 %v606_v62 }
 0x15a   : > { %639 = vmatpush.msra.mxu0 %v606_v62  ;;  %856 = vmatpush.msra.mxu1 %v606_v62 }
 0x15b   : > { %860 = vmatpush.msra.mxu2 %v605_v35  ;;  %861 = vmatpush.msra.mxu3 %v605_v35 }
 0x15c   : > { %659 = vmatmul.f32.vlgmr.msra.gmra.mxu2 %v597_v36  ;;  %671 = vmatmul.f32.vlgmr.msra.gmra.mxu3 %v601_v38 }
 0x15d   : > { %640 = vmatpush.msra.mxu0 %v605_v35  ;;  %859 = vmatpush.msra.mxu1 %v605_v35 }
 0x15e   : > { %641 = vmatmul.f32.vlgmr.msra.gmra.mxu0 %v591_v41  ;;  %650 = vmatmul.f32.vlgmr.msra.gmra.mxu1 %v594_v42 }
 0x164   : > { %662 = vmatmul.f32.gmra.mxu2 %v598_v4  ;;  %674 = vmatmul.f32.gmra.mxu3 %v602_v47 }
 0x166   : > { %644 = vmatmul.f32.gmra.mxu0 %v592_v49  ;;  %653 = vmatmul.f32.gmra.mxu1 %v595_v50 }
 0x16c   : > { %665 = vmatmul.f32.gmra.mxu2 %v599_v55  ;;  %677 = vmatmul.f32.gmra.mxu3 %v603_v56 }
 0x16e   : > { %647 = vmatmul.f32.gmra.mxu0 %v593_v57  ;;  %656 = vmatmul.f32.gmra.mxu1 %v596_v58 }
 0x174   : > { %668 = vmatmul.f32.gmra.mxu2 %v600_v61  ;;  %680 = vmatmul.f32.gmra.mxu3 %v604_v63 }
 0x1db   : > { %v642_v0 = vpop.f32.mrf.mxu0  ;;  %v651_v37 = vpop.f32.mrf.mxu1 }
 0x1dc   : > { %v643_v2 = vadd.f32 %v891_v13, %v642_v0  ;;  %v652_v3 = vadd.f32 %v891_v13, %v651_v37 }
 0x1de   : > { %684 = vst [vmem:[%s1385_s6] sm:$0xff] %v643_v2 }
 0x1df   : > { %v660_v5 = vpop.f32.mrf.mxu2  ;;  %v672_v6 = vpop.f32.mrf.mxu3  ;;  %687 = vst [vmem:[%s1385_s6 + $0x18] sm:$0xff] %v652_v3 }
 0x1e0   : > { %v661_v8 = vadd.f32 %v891_v13, %v660_v5  ;;  %v673_v9 = vadd.f32 %v891_v13, %v672_v6 }
 0x1e2   : > { %690 = vst [vmem:[%s1385_s6 + $0x30] sm:$0xff] %v661_v8 }
 0x1e3   : > { %694 = vst [vmem:[%s1385_s6 + $0x50] sm:$0xff] %v673_v9  ;;  %v645_v11 = vpop.f32.mrf.mxu0  ;;  %v654_v12 = vpop.f32.mrf.mxu1 }
 0x1e4   : > { %v646_v14 = vadd.f32 %v891_v13, %v645_v11  ;;  %v655_v15 = vadd.f32 %v891_v13, %v654_v12 }
 0x1e6   : > { %685 = vst [vmem:[%s1385_s6 + $0x8] sm:$0xff] %v646_v14 }
 0x1e7   : > { %v663_v17 = vpop.f32.mrf.mxu2  ;;  %v675_v18 = vpop.f32.mrf.mxu3  ;;  %688 = vst [vmem:[%s1385_s6 + $0x20] sm:$0xff] %v655_v15 }
 0x1e8   : > { %v664_v20 = vadd.f32 %v891_v13, %v663_v17  ;;  %v676_v21 = vadd.f32 %v891_v13, %v675_v18 }
 0x1ea   : > { %691 = vst [vmem:[%s1385_s6 + $0x38] sm:$0xff] %v664_v20 }
 0x1eb   : > { %695 = vst [vmem:[%s1385_s6 + $0x58] sm:$0xff] %v676_v21  ;;  %v648_v23 = vpop.f32.mrf.mxu0  ;;  %v657_v24 = vpop.f32.mrf.mxu1 }
 0x1ec   : > { %v649_v26 = vadd.f32 %v891_v13, %v648_v23  ;;  %v658_v27 = vadd.f32 %v891_v13, %v657_v24 }
 0x1ee   : > { %686 = vst [vmem:[%s1385_s6 + $0x10] sm:$0xff] %v649_v26 }
 0x1ef   : > { %v666_v29 = vpop.f32.mrf.mxu2  ;;  %v678_v34 = vpop.f32.mrf.mxu3  ;;  %689 = vst [vmem:[%s1385_s6 + $0x28] sm:$0xff] %v658_v27 }
 0x1f0   : > { %v667_v19 = vadd.f32 %v891_v13, %v666_v29  ;;  %v679_v30 = vadd.f32 %v891_v13, %v678_v34 }
 0x1f2   : > { %692 = vst [vmem:[%s1385_s6 + $0x40] sm:$0xff] %v667_v19 }
 0x1f3   : > { %696 = vst [vmem:[%s1385_s6 + $0x60] sm:$0xff] %v679_v30 }
 0x1f7   : > { %v669_v32 = vpop.f32.mrf.mxu2  ;;  %v681_v62 = vpop.f32.mrf.mxu3 }
 0x1f8   : > { %v670_v16 = vadd.f32 %v891_v13, %v669_v32  ;;  %v682_v33 = vadd.f32 %v891_v13, %v681_v62 }
 0x1fa   : > { %693 = vst [vmem:[%s1385_s6 + $0x48] sm:$0xff] %v670_v16 }
 0x1fb   : > { %697 = vst [vmem:[%s1385_s6 + $0x68] sm:$0xff] %v682_v33 }
 0x1fc PF: > { %s16_s23 = sadd.s32 1, %s914_s23   ;;  %s1386_s21 = smov %s910_s22 }
 0x1fd   : > { %p13_p7 = scmp.ge.s32.totalorder %s16_s23, 4   ;;  %s1387_s22 = smov %s1389_s24 }
 0x1ff   :  { %15 = sbr.rel (!%p13_p7) target bundleno = 2 (0x2), region = 90 }

</bundles_post_ra>
